<compile_context>
chip_gen: v5e
topology: v5e:2x2
jax: 0.10.0
libtpu: 0.0.40
codegen_flags: <defaults>
</compile_context>

<pallas_src>
import functools
import math
import warnings

import numpy as np
import jax
import jax.numpy as jnp
from jax.experimental import pallas as pl
from jax.experimental.pallas import tpu as pltpu


_LOGIT_LO = math.log(1e-4) - math.log(1.0 - 1e-4)        # logit(1e-4)
_LOGIT_HI = math.log(0.9999) - math.log(1.0 - 0.9999)    # logit(0.9999)


def _round_up(n, m):
    return ((n + m - 1) // m) * m


# ---------------------------------------------------------------------------
# Pallas kernel: one batch tile -> (5K+4, 1) partial sums
# ---------------------------------------------------------------------------
def _dr_cmi_kernel(x_ref, y_ref, wcol_ref, w2_ref, rm_ref, sc_ref, out_ref,
                   *, D, K, TB, B_true):
    f32 = jnp.float32
    dm1 = float(D - 1)
    pid = pl.program_id(0)

    x = x_ref[...]                                    # (D, TB): features lead, batch on lanes
    sc = sc_ref[...]                                  # (8, 1) scalar constants

    # valid-lane mask for the zero-padded tail of the final batch tile
    lane = jax.lax.broadcasted_iota(jnp.int32, (1, TB), 1)
    valid = ((pid * TB + lane) < B_true).astype(f32)  # (1, TB)

    # --- MXU: row 0 = propensity logit (minus bias), row 1 = sum over features
    r0 = jnp.dot(rm_ref[...], x, preferred_element_type=f32)        # (8, TB)
    prop = jnp.clip(r0[0:1, :] + sc[0:1, 0:1], _LOGIT_LO, _LOGIT_HI)
    w1g = 1.0 + jnp.exp(-prop)                        # == 1 / propensity_score
    w0g = 1.0 + jnp.exp(prop)                         # == 1 / (1 - propensity_score)
    sum_x = r0[1:2, :]                                # (1, TB)

    t = x[D - 1:D, :]                                 # treatment column
    m0 = (t == 0.0).astype(f32) * valid
    m1 = (t == 1.0).astype(f32) * valid
    w0m0 = w0g * m0
    w1m1 = w1g * m1

    # --- rank-1 "linear_map + mean" folded into each head's first Linear -----
    c_pos = wcol_ref[:, 0:1]      # (HH, 1)  [mu|logvar] W1 @ wm / D
    d_pos = wcol_ref[:, 1:2]      #          W1 @ bm + b1            (full mean, k == 0)
    d_posS = wcol_ref[:, 2:3]     #          (D-1)/D * W1@bm + b1    (stale masked mean, k >= 1)
    c_neg = wcol_ref[:, 3:4]
    d_neg = wcol_ref[:, 4:5]
    w2p = w2_ref[0:8, :]          # (8, HH): rows 0/1 = mu/logvar second Linear, rest 0
    w2n = w2_ref[8:16, :]
    b2_mu, b2_lv = sc[1:2, 0:1], sc[2:3, 0:1]
    b2_mun, b2_lvn = sc[3:4, 0:1], sc[4:5, 0:1]

    def head_stats(s, c1, d1, w2s, bmu, blv):
        # first Linear as a rank-1 broadcast (VPU) -> relu (VPU) -> second
        # Linear + hidden reduction as a single MXU matmul (f32 in / f32 acc)
        h = jnp.maximum(c1 * s + d1, 0.0)                            # (HH, TB)
        r = jnp.dot(w2s, h, preferred_element_type=f32)              # (8, TB)  MXU
        mu = r[0:1, :] + bmu
        lv = jnp.tanh(r[1:2, :] + blv)                               # EUP
        iv = 0.5 * jnp.exp(-lv)                                      # EUP
        # quadratic expansion stats: llh(y) = -A + 2y*B - y^2*C
        return mu * mu * iv + 0.5 * lv, mu * iv, iv

    # negative heads, folded over the D-1 masked dims (static unrolled loop)
    NA = jnp.zeros((1, TB), f32)
    NB = jnp.zeros((1, TB), f32)
    NC = jnp.zeros((1, TB), f32)
    for i in range(D - 1):
        na, nb, nc = head_stats(sum_x - x[i:i + 1, :], c_neg, d_neg, w2n,
                                b2_mun, b2_lvn)
        NA += na
        NB += nb
        NC += nc

    # positive head, k == 0 variant (full mean)
    PA, PB, PC = head_stats(sum_x, c_pos, d_pos, w2p, b2_mu, b2_lv)
    A0 = NA - dm1 * PA
    B0 = dm1 * PB - NB
    C0 = dm1 * PC - NC
    if K > 1:
        # reproduce the upstream stale max_values (i = D-2) reuse for k >= 1
        PA, PB, PC = head_stats(sum_x - x[D - 2:D - 1, :], c_pos, d_posS, w2p,
                                b2_mu, b2_lv)
        AS = NA - dm1 * PA
        BS = dm1 * PB - NB
        CS = dm1 * PC - NC

    # --- per-tile partial sums (one lane reduce per stat, no accumulator RMW)
    masks = jnp.concatenate([m0, m1, w0m0, w1m1, valid], axis=0)     # (5, TB)
    cols = []
    for k in range(K):
        yk = y_ref[k:k + 1, :]                                       # (1, TB)
        Ak, Bk, Ck = (A0, B0, C0) if k == 0 else (AS, BS, CS)
        dsum = Ak + yk * (2.0 * Bk - yk * Ck)                        # (1, TB)
        cols.append(jnp.sum(dsum * masks, axis=1, keepdims=True))    # (5, 1)
    cols.append(jnp.sum(masks[0:4, :], axis=1, keepdims=True))       # (4, 1)
    out_ref[...] = jnp.concatenate(cols, axis=0).reshape(1, 5 * K + 4, 1)


# ---------------------------------------------------------------------------
# Parameter packing (plain jnp, outside the kernel; torch-convention weights in)
# ---------------------------------------------------------------------------
def pack_params(params, x_dim):
    f32 = jnp.float32
    D = x_dim
    P = {k: jnp.asarray(v, f32) for k, v in params.items()}
    h2 = P["mu_b1"].shape[0]
    HH = 2 * h2

    W1p = jnp.concatenate([P["mu_w1"], P["lv_w1"]], axis=0)       # (HH, D)
    W1n = jnp.concatenate([P["mun_w1"], P["lvn_w1"]], axis=0)
    b1p = jnp.concatenate([P["mu_b1"], P["lv_b1"]], axis=0)       # (HH,)
    b1n = jnp.concatenate([P["mun_b1"], P["lvn_b1"]], axis=0)
    wm = P["wm"][:, 0]                                            # (D,)
    bm = P["bm"]                                                  # (D,)

    c_pos = (W1p @ wm) / float(D)
    wb_p = W1p @ bm
    d_pos = wb_p + b1p                                            # full mean (k == 0)
    d_posS = wb_p * ((D - 1.0) / float(D)) + b1p                  # stale masked mean (k >= 1)
    c_neg = (W1n @ wm) / float(D)
    d_neg = (W1n @ bm) * ((D - 1.0) / float(D)) + b1n

    z = jnp.zeros((HH,), f32)
    wcol = jnp.stack([c_pos, d_pos, d_posS, c_neg, d_neg, z, z, z], axis=1)  # (HH, 8)

    zh = jnp.zeros((h2,), f32)
    w2_rows = ([jnp.concatenate([P["mu_w2"][0], zh]),             # pos mu
                jnp.concatenate([zh, P["lv_w2"][0]])]             # pos logvar
               + [z] * 6
               + [jnp.concatenate([P["mun_w2"][0], zh]),          # neg mu
                  jnp.concatenate([zh, P["lvn_w2"][0]])]          # neg logvar
               + [z] * 6)
    w2s = jnp.stack(w2_rows, axis=0)                              # (16, HH)

    rm = jnp.zeros((8, D), f32)
    rm = rm.at[0, :D - 1].set(P["ws"][0])                         # propensity weights (treatment col excluded)
    rm = rm.at[1, :].set(1.0)                                     # row of ones -> sum_x

    sc = jnp.concatenate([P["bs"], P["mu_b2"], P["lv_b2"], P["mun_b2"],
                          P["lvn_b2"], jnp.zeros((3,), f32)]).reshape(8, 1)
    return wcol, w2s, rm, sc, h2


# ---------------------------------------------------------------------------
# Wrapper
# ---------------------------------------------------------------------------
def dr_cmi_forward(x, y, params, *, max_tile=4096):
    """Returns the (K,) vector of |dr| values (the torch `drs` list)."""
    f32 = jnp.float32
    B, D = x.shape
    K = y.shape[1]
    wcol, w2s, rm, sc, h2 = pack_params(params, D)
    HH = 2 * h2

    # lane-dense batch tiling: batch on the lane axis, tile <= max_tile lanes
    max_tile = max(128, (max_tile // 128) * 128)
    TB = min(max_tile, _round_up(B, 128))
    B_pad = _round_up(B, TB)
    nsteps = B_pad // TB
    nstat = 5 * K + 4

    xT = jnp.pad(jnp.asarray(x, f32).T, ((0, 0), (0, B_pad - B)))   # (D, B_pad)
    yT = jnp.pad(jnp.asarray(y, f32).T, ((0, 0), (0, B_pad - B)))   # (K, B_pad)

    kernel = functools.partial(_dr_cmi_kernel, D=D, K=K, TB=TB, B_true=B)

    parts = pl.pallas_call(
        kernel,
        out_shape=jax.ShapeDtypeStruct((nsteps, nstat, 1), f32),
        grid_spec=pltpu.PrefetchScalarGridSpec(
            num_scalar_prefetch=0,
            grid=(nsteps,),
            in_specs=[
                pl.BlockSpec((D, TB), lambda b: (0, b)),
                pl.BlockSpec((K, TB), lambda b: (0, b)),
                pl.BlockSpec((HH, 8), lambda b: (0, 0)),
                pl.BlockSpec((16, HH), lambda b: (0, 0)),
                pl.BlockSpec((8, D), lambda b: (0, 0)),
                pl.BlockSpec((8, 1), lambda b: (0, 0)),
            ],
            out_specs=pl.BlockSpec((1, nstat, 1), lambda b: (b, 0, 0)),
        ),
        compiler_params=pltpu.CompilerParams(
            dimension_semantics=("parallel",),   # per-step partials -> megacore-safe
            vmem_limit_bytes=48 * 1024 * 1024,   # within v7x's 64 MiB physical VMEM
        ),
    )(xT, yT, wcol, w2s, rm, sc)

    # --- tiny O(K) scalar epilogue (kept in jnp so the grid stays parallel) --
    totals = jnp.sum(parts[:, :, 0], axis=0)                         # (5K+4,)
    g = 5 * K
    dm1 = float(D - 1)
    n0, n1 = totals[g + 0], totals[g + 1]
    sw0, sw1 = totals[g + 2], totals[g + 3]
    inv0 = 1.0 / (jnp.maximum(n0, 1.0) * dm1)
    inv1 = 1.0 / (jnp.maximum(n1, 1.0) * dm1)
    inv_all = 1.0 / (float(B) * dm1)
    empty = jnp.logical_or(n0 < 0.5, n1 < 0.5)                       # explicit empty-group check
    drs = []
    for k in range(K):
        sd0, sd1, swd0, swd1, sall = (totals[5 * k + j] for j in range(5))
        cmi0 = sd0 * inv0
        cmi1 = sd1 * inv1
        dr0m = (swd0 - cmi0 * dm1 * sw0) * inv0          # == dr_0.mean()
        dr1m = (swd1 - cmi1 * dm1 * sw1) * inv1          # == dr_1.mean()
        dr_main = 0.5 * (cmi0 + dr0m) + 0.5 * (cmi1 + dr1m)
        dr_fb = sall * inv_all
        bad = jnp.logical_or(empty,
                             jnp.logical_or(jnp.isnan(dr0m), jnp.isnan(dr1m)))
        drs.append(jnp.abs(jnp.where(bad, dr_fb, dr_main)))
    return jnp.stack(drs)


# ---------------------------------------------------------------------------
# Deterministic parameter init (torch nn.Linear conventions & shapes)
# ---------------------------------------------------------------------------
def _init_linear(key, fan_in, fan_out):
    kw, kb = jax.random.split(key)
    bound = 1.0 / math.sqrt(fan_in)
    w = jax.random.uniform(kw, (fan_out, fan_in), jnp.float32, -bound, bound)
    b = jax.random.uniform(kb, (fan_out,), jnp.float32, -bound, bound)
    return w, b


def init_params(key, x_dim, hidden_size):
    h2 = hidden_size // 2
    keys = jax.random.split(key, 6)

    def head(k, p):
        k1, k2 = jax.random.split(k)
        w1, b1 = _init_linear(k1, x_dim, h2)   # (h2, x_dim), (h2,)
        w2, b2 = _init_linear(k2, h2, 1)       # (1, h2), (1,)
        return {p + "_w1": w1, p + "_b1": b1, p + "_w2": w2, p + "_b2": b2}

    P = {}
    P.update(head(keys[0], "mu"))
    P.update(head(keys[1], "lv"))
    P.update(head(keys[2], "mun"))
    P.update(head(keys[3], "lvn"))
    wm, bm = _init_linear(keys[4], 1, x_dim)        # (x_dim, 1), (x_dim,)
    ws, bs = _init_linear(keys[5], x_dim - 1, 1)    # (1, x_dim-1), (1,)
    P.update({"wm": wm, "bm": bm, "ws": ws, "bs": bs})
    return P


# ---------------------------------------------------------------------------
# Pure-numpy reference that follows the PyTorch code line-by-line
# ---------------------------------------------------------------------------
def reference_forward(x_in, y_in, P):
    x = np.asarray(x_in, np.float64)
    y = np.asarray(y_in, np.float64)
    B, D = x.shape
    K = y.shape[1]
    g = lambda k: np.asarray(P[k], np.float64)

    def lin_head(v, p):                      # torch convention: W is (out, in)
        h = np.maximum(v @ g(p + "_w1").T + g(p + "_b1"), 0.0)
        return h @ g(p + "_w2").T + g(p + "_b2")

    prop = x[:, :D - 1] @ g("ws").T + g("bs")
    psig = 1.0 / (1.0 + np.exp(-prop))
    psig = np.where(psig < 1e-4, 1e-4, psig)
    psig = np.where(psig > 0.9999, 0.9999, psig)
    w1w, w0w = 1.0 / psig, 1.0 / (1.0 - psig)
    inds1 = np.where(x[:, -1] == 1.0)[0]
    inds0 = np.where(x[:, -1] == 0.0)[0]

    wm, bm = g("wm")[:, 0], g("bm")
    xm = x[:, :, None] * wm[None, None, :] + bm[None, None, :]   # (B, D, D)
    max_values = xm.mean(axis=1)

    drs = []
    for k in range(K):
        mu = lin_head(max_values, "mu")
        lv = np.tanh(lin_head(max_values, "lv"))
        positive = (-(mu - y[:, k:k + 1]) ** 2 / 2.0 / np.exp(lv) - lv / 2.0).sum(-1)
        negs = []
        for i in range(D - 1):
            xn = xm.copy()
            xn[:, i, :] = 0.0
            max_values = xn.mean(axis=1)
            mu_n = lin_head(max_values, "mun")
            lv_n = np.tanh(lin_head(max_values, "lvn"))
            negs.append((-(mu_n - y[:, k:k + 1]) ** 2 / 2.0 / np.exp(lv_n)
                         - lv_n / 2.0).sum(-1))
        negative = np.stack(negs, axis=1)
        diff = positive[:, None] - negative
        cmi0, cmi1 = diff[inds0].mean(), diff[inds1].mean()
        dr0 = w0w[inds0] * (diff[inds0] - cmi0)
        dr1 = w1w[inds1] * (diff[inds1] - cmi1)
        if np.isnan(dr0.mean()) or np.isnan(dr1.mean()):
            dr = diff.mean()
        else:
            dr = 0.5 * (cmi0 + dr0).mean() + 0.5 * (cmi1 + dr1).mean()
        drs.append(abs(dr))
    return np.array(drs)


# ---------------------------------------------------------------------------
if __name__ == "__main__":
    B, x_dim, K, hidden = 8, 8, 2, 64

    key = jax.random.PRNGKey(0)
    kx, ky, kp = jax.random.split(key, 3)

    x = jax.random.normal(kx, (B, x_dim), jnp.float32)
    # last column is the binary treatment indicator (both groups present)
    x = x.at[:, -1].set((jnp.arange(B) % 2).astype(jnp.float32))
    y = jax.random.normal(ky, (B, K), jnp.float32)
    params = init_params(kp, x_dim, hidden)
    np_params = {k: np.asarray(v) for k, v in params.items()}

    # main doubly-robust path
    out = jax.block_until_ready(dr_cmi_forward(x, y, params))
    ref = reference_forward(np.asarray(x), np.asarray(y), np_params)
    np.testing.assert_allclose(np.asarray(out), ref, rtol=2e-2, atol=2e-3)

    # empty-group fallback path (all samples treated) — exercises the dr_fb branch
    x_fb = x.at[:, -1].set(1.0)
    out_fb = jax.block_until_ready(dr_cmi_forward(x_fb, y, params))
    with warnings.catch_warnings():
        warnings.simplefilter("ignore")
        ref_fb = reference_forward(np.asarray(x_fb), np.asarray(y), np_params)
    np.testing.assert_allclose(np.asarray(out_fb), ref_fb, rtol=2e-2, atol=2e-3)

    print("KERNEL_OK")
</pallas_src>

<mosaic_0001>
module attributes {stable_mosaic.version = 11 : i64} {
  func.func @_dr_cmi_kernel(%arg0: i32, %arg1: memref<8x128xf32, #tpu.memory_space<vmem>>, %arg2: memref<2x128xf32, #tpu.memory_space<vmem>>, %arg3: memref<64x8xf32, #tpu.memory_space<vmem>>, %arg4: memref<16x64xf32, #tpu.memory_space<vmem>>, %arg5: memref<8x8xf32, #tpu.memory_space<vmem>>, %arg6: memref<8x1xf32, #tpu.memory_space<vmem>>, %arg7: memref<1x14x1xf32, #tpu.memory_space<vmem>>) attributes {dimension_semantics = [#tpu.dimension_semantics<parallel>], iteration_bounds = array<i64: 1>, scalar_prefetch = 0 : i64, scratch_operands = 0 : i64, tpu.core_type = #tpu.core_type<tc>, window_params = [{transform_indices = @transform_0, window_bounds = array<i64: 8, 128>}, {transform_indices = @transform_1, window_bounds = array<i64: 2, 128>}, {pipeline_mode = #tpu.pipeline_mode<synchronous>, transform_indices = @transform_2, window_bounds = array<i64: 64, 8>}, {pipeline_mode = #tpu.pipeline_mode<synchronous>, transform_indices = @transform_3, window_bounds = array<i64: 16, 64>}, {pipeline_mode = #tpu.pipeline_mode<synchronous>, transform_indices = @transform_4, window_bounds = array<i64: 8, 8>}, {pipeline_mode = #tpu.pipeline_mode<synchronous>, transform_indices = @transform_5, window_bounds = array<i64: 8, 1>}, {transform_indices = @transform_6, window_bounds = array<i64: 1, 14, 1>}]} {
    %c0 = arith.constant 0 : index
    %c0_0 = arith.constant 0 : index
    %0 = vector.load %arg1[%c0, %c0_0] : memref<8x128xf32, #tpu.memory_space<vmem>>, vector<8x128xf32>
    %c0_1 = arith.constant 0 : index
    %c0_2 = arith.constant 0 : index
    %1 = vector.load %arg6[%c0_1, %c0_2] : memref<8x1xf32, #tpu.memory_space<vmem>>, vector<8x1xf32>
    %2 = tpu.iota {dimensions = array<i32: 1>} : vector<1x128xi32>
    %c128_i32 = arith.constant 128 : i32
    %3 = arith.muli %arg0, %c128_i32 : i32
    %4 = vector.broadcast %3 : i32 to vector<1x128xi32>
    %5 = arith.addi %4, %2 : vector<1x128xi32>
    %c8_i32 = arith.constant 8 : i32
    %6 = vector.broadcast %c8_i32 : i32 to vector<1x128xi32>
    %7 = arith.cmpi slt, %5, %6 : vector<1x128xi32>
    %8 = arith.extui %7 : vector<1x128xi1> to vector<1x128xi32>
    %9 = arith.sitofp %8 : vector<1x128xi32> to vector<1x128xf32>
    %c0_3 = arith.constant 0 : index
    %c0_4 = arith.constant 0 : index
    %10 = vector.load %arg5[%c0_3, %c0_4] : memref<8x8xf32, #tpu.memory_space<vmem>>, vector<8x8xf32>
    %cst = arith.constant dense<0.000000e+00> : vector<8x128xf32>
    %11 = tpu.matmul %10, %0, %cst {dimension_numbers = #tpu.dot_dimension_numbers<[1], [0], [0], [1], [0, 0, 1, 1], [], []>} : vector<8x8xf32>, vector<8x128xf32>, vector<8x128xf32> -> vector<8x128xf32>
    %12 = vector.extract_strided_slice %11 {offsets = [0, 0], sizes = [1, 128], strides = [1, 1]} : vector<8x128xf32> to vector<1x128xf32>
    %13 = vector.extract_strided_slice %1 {offsets = [0, 0], sizes = [1, 1], strides = [1, 1]} : vector<8x1xf32> to vector<1x1xf32>
    %14 = vector.broadcast %13 : vector<1x1xf32> to vector<1x128xf32>
    %15 = arith.addf %12, %14 : vector<1x128xf32>
    %cst_5 = arith.constant -9.210240e+00 : f32
    %cst_6 = arith.constant 9.210240e+00 : f32
    %16 = vector.broadcast %cst_5 : f32 to vector<1x128xf32>
    %17 = arith.maximumf %16, %15 : vector<1x128xf32>
    %18 = vector.broadcast %cst_6 : f32 to vector<1x128xf32>
    %19 = arith.minimumf %18, %17 : vector<1x128xf32>
    %cst_7 = arith.constant 0.000000e+00 : f32
    %20 = vector.broadcast %cst_7 : f32 to vector<1x128xf32>
    %21 = arith.subf %20, %19 : vector<1x128xf32>
    %22 = math.exp %21 : vector<1x128xf32>
    %cst_8 = arith.constant 1.000000e+00 : f32
    %23 = vector.broadcast %cst_8 : f32 to vector<1x128xf32>
    %24 = arith.addf %23, %22 : vector<1x128xf32>
    %25 = math.exp %19 : vector<1x128xf32>
    %cst_9 = arith.constant 1.000000e+00 : f32
    %26 = vector.broadcast %cst_9 : f32 to vector<1x128xf32>
    %27 = arith.addf %26, %25 : vector<1x128xf32>
    %28 = vector.extract_strided_slice %11 {offsets = [1, 0], sizes = [1, 128], strides = [1, 1]} : vector<8x128xf32> to vector<1x128xf32>
    %29 = vector.extract_strided_slice %0 {offsets = [7, 0], sizes = [1, 128], strides = [1, 1]} : vector<8x128xf32> to vector<1x128xf32>
    %cst_10 = arith.constant 0.000000e+00 : f32
    %30 = vector.broadcast %cst_10 : f32 to vector<1x128xf32>
    %31 = arith.cmpf oeq, %29, %30 : vector<1x128xf32>
    %32 = arith.extui %31 : vector<1x128xi1> to vector<1x128xi32>
    %33 = arith.sitofp %32 : vector<1x128xi32> to vector<1x128xf32>
    %34 = arith.mulf %33, %9 : vector<1x128xf32>
    %cst_11 = arith.constant 1.000000e+00 : f32
    %35 = vector.broadcast %cst_11 : f32 to vector<1x128xf32>
    %36 = arith.cmpf oeq, %29, %35 : vector<1x128xf32>
    %37 = arith.extui %36 : vector<1x128xi1> to vector<1x128xi32>
    %38 = arith.sitofp %37 : vector<1x128xi32> to vector<1x128xf32>
    %39 = arith.mulf %38, %9 : vector<1x128xf32>
    %40 = arith.mulf %27, %34 : vector<1x128xf32>
    %41 = arith.mulf %24, %39 : vector<1x128xf32>
    %c0_12 = arith.constant 0 : index
    %c0_13 = arith.constant 0 : index
    %42 = vector.load %arg3[%c0_12, %c0_13] : memref<64x8xf32, #tpu.memory_space<vmem>>, vector<64x1xf32>
    %c0_14 = arith.constant 0 : index
    %c1 = arith.constant 1 : index
    %43 = vector.load %arg3[%c0_14, %c1] : memref<64x8xf32, #tpu.memory_space<vmem>>, vector<64x1xf32>
    %c0_15 = arith.constant 0 : index
    %c2 = arith.constant 2 : index
    %44 = vector.load %arg3[%c0_15, %c2] : memref<64x8xf32, #tpu.memory_space<vmem>>, vector<64x1xf32>
    %c0_16 = arith.constant 0 : index
    %c3 = arith.constant 3 : index
    %45 = vector.load %arg3[%c0_16, %c3] : memref<64x8xf32, #tpu.memory_space<vmem>>, vector<64x1xf32>
    %c0_17 = arith.constant 0 : index
    %c4 = arith.constant 4 : index
    %46 = vector.load %arg3[%c0_17, %c4] : memref<64x8xf32, #tpu.memory_space<vmem>>, vector<64x1xf32>
    %c0_18 = arith.constant 0 : index
    %c0_19 = arith.constant 0 : index
    %47 = vector.load %arg4[%c0_18, %c0_19] : memref<16x64xf32, #tpu.memory_space<vmem>>, vector<8x64xf32>
    %c8 = arith.constant 8 : index
    %c0_20 = arith.constant 0 : index
    %48 = vector.load %arg4[%c8, %c0_20] : memref<16x64xf32, #tpu.memory_space<vmem>>, vector<8x64xf32>
    %49 = vector.extract_strided_slice %1 {offsets = [1, 0], sizes = [1, 1], strides = [1, 1]} : vector<8x1xf32> to vector<1x1xf32>
    %50 = vector.extract_strided_slice %1 {offsets = [2, 0], sizes = [1, 1], strides = [1, 1]} : vector<8x1xf32> to vector<1x1xf32>
    %51 = vector.extract_strided_slice %1 {offsets = [3, 0], sizes = [1, 1], strides = [1, 1]} : vector<8x1xf32> to vector<1x1xf32>
    %52 = vector.extract_strided_slice %1 {offsets = [4, 0], sizes = [1, 1], strides = [1, 1]} : vector<8x1xf32> to vector<1x1xf32>
    %cst_21 = arith.constant 0.000000e+00 : f32
    %53 = vector.broadcast %cst_21 : f32 to vector<1x128xf32>
    %cst_22 = arith.constant 0.000000e+00 : f32
    %54 = vector.broadcast %cst_22 : f32 to vector<1x128xf32>
    %cst_23 = arith.constant 0.000000e+00 : f32
    %55 = vector.broadcast %cst_23 : f32 to vector<1x128xf32>
    %56 = vector.extract_strided_slice %0 {offsets = [0, 0], sizes = [1, 128], strides = [1, 1]} : vector<8x128xf32> to vector<1x128xf32>
    %57 = arith.subf %28, %56 : vector<1x128xf32>
    %58 = vector.broadcast %45 : vector<64x1xf32> to vector<64x128xf32>
    %59 = vector.broadcast %57 : vector<1x128xf32> to vector<64x128xf32>
    %60 = arith.mulf %58, %59 : vector<64x128xf32>
    %61 = vector.broadcast %46 : vector<64x1xf32> to vector<64x128xf32>
    %62 = arith.addf %60, %61 : vector<64x128xf32>
    %cst_24 = arith.constant 0.000000e+00 : f32
    %63 = vector.broadcast %cst_24 : f32 to vector<64x128xf32>
    %64 = arith.maximumf %62, %63 : vector<64x128xf32>
    %cst_25 = arith.constant dense<0.000000e+00> : vector<8x128xf32>
    %65 = tpu.matmul %48, %64, %cst_25 {dimension_numbers = #tpu.dot_dimension_numbers<[1], [0], [0], [1], [0, 0, 1, 1], [], []>} : vector<8x64xf32>, vector<64x128xf32>, vector<8x128xf32> -> vector<8x128xf32>
    %66 = vector.extract_strided_slice %65 {offsets = [0, 0], sizes = [1, 128], strides = [1, 1]} : vector<8x128xf32> to vector<1x128xf32>
    %67 = vector.broadcast %51 : vector<1x1xf32> to vector<1x128xf32>
    %68 = arith.addf %66, %67 : vector<1x128xf32>
    %69 = vector.extract_strided_slice %65 {offsets = [1, 0], sizes = [1, 128], strides = [1, 1]} : vector<8x128xf32> to vector<1x128xf32>
    %70 = vector.broadcast %52 : vector<1x1xf32> to vector<1x128xf32>
    %71 = arith.addf %69, %70 : vector<1x128xf32>
    %72 = math.tanh %71 : vector<1x128xf32>
    %cst_26 = arith.constant 0.000000e+00 : f32
    %73 = vector.broadcast %cst_26 : f32 to vector<1x128xf32>
    %74 = arith.subf %73, %72 : vector<1x128xf32>
    %75 = math.exp %74 : vector<1x128xf32>
    %cst_27 = arith.constant 5.000000e-01 : f32
    %76 = vector.broadcast %cst_27 : f32 to vector<1x128xf32>
    %77 = arith.mulf %76, %75 : vector<1x128xf32>
    %78 = arith.mulf %68, %68 : vector<1x128xf32>
    %79 = arith.mulf %78, %77 : vector<1x128xf32>
    %cst_28 = arith.constant 5.000000e-01 : f32
    %80 = vector.broadcast %cst_28 : f32 to vector<1x128xf32>
    %81 = arith.mulf %80, %72 : vector<1x128xf32>
    %82 = arith.addf %79, %81 : vector<1x128xf32>
    %83 = arith.mulf %68, %77 : vector<1x128xf32>
    %84 = arith.addf %53, %82 : vector<1x128xf32>
    %85 = arith.addf %54, %83 : vector<1x128xf32>
    %86 = arith.addf %55, %77 : vector<1x128xf32>
    %87 = vector.extract_strided_slice %0 {offsets = [1, 0], sizes = [1, 128], strides = [1, 1]} : vector<8x128xf32> to vector<1x128xf32>
    %88 = arith.subf %28, %87 : vector<1x128xf32>
    %89 = vector.broadcast %45 : vector<64x1xf32> to vector<64x128xf32>
    %90 = vector.broadcast %88 : vector<1x128xf32> to vector<64x128xf32>
    %91 = arith.mulf %89, %90 : vector<64x128xf32>
    %92 = vector.broadcast %46 : vector<64x1xf32> to vector<64x128xf32>
    %93 = arith.addf %91, %92 : vector<64x128xf32>
    %cst_29 = arith.constant 0.000000e+00 : f32
    %94 = vector.broadcast %cst_29 : f32 to vector<64x128xf32>
    %95 = arith.maximumf %93, %94 : vector<64x128xf32>
    %cst_30 = arith.constant dense<0.000000e+00> : vector<8x128xf32>
    %96 = tpu.matmul %48, %95, %cst_30 {dimension_numbers = #tpu.dot_dimension_numbers<[1], [0], [0], [1], [0, 0, 1, 1], [], []>} : vector<8x64xf32>, vector<64x128xf32>, vector<8x128xf32> -> vector<8x128xf32>
    %97 = vector.extract_strided_slice %96 {offsets = [0, 0], sizes = [1, 128], strides = [1, 1]} : vector<8x128xf32> to vector<1x128xf32>
    %98 = vector.broadcast %51 : vector<1x1xf32> to vector<1x128xf32>
    %99 = arith.addf %97, %98 : vector<1x128xf32>
    %100 = vector.extract_strided_slice %96 {offsets = [1, 0], sizes = [1, 128], strides = [1, 1]} : vector<8x128xf32> to vector<1x128xf32>
    %101 = vector.broadcast %52 : vector<1x1xf32> to vector<1x128xf32>
    %102 = arith.addf %100, %101 : vector<1x128xf32>
    %103 = math.tanh %102 : vector<1x128xf32>
    %cst_31 = arith.constant 0.000000e+00 : f32
    %104 = vector.broadcast %cst_31 : f32 to vector<1x128xf32>
    %105 = arith.subf %104, %103 : vector<1x128xf32>
    %106 = math.exp %105 : vector<1x128xf32>
    %cst_32 = arith.constant 5.000000e-01 : f32
    %107 = vector.broadcast %cst_32 : f32 to vector<1x128xf32>
    %108 = arith.mulf %107, %106 : vector<1x128xf32>
    %109 = arith.mulf %99, %99 : vector<1x128xf32>
    %110 = arith.mulf %109, %108 : vector<1x128xf32>
    %cst_33 = arith.constant 5.000000e-01 : f32
    %111 = vector.broadcast %cst_33 : f32 to vector<1x128xf32>
    %112 = arith.mulf %111, %103 : vector<1x128xf32>
    %113 = arith.addf %110, %112 : vector<1x128xf32>
    %114 = arith.mulf %99, %108 : vector<1x128xf32>
    %115 = arith.addf %84, %113 : vector<1x128xf32>
    %116 = arith.addf %85, %114 : vector<1x128xf32>
    %117 = arith.addf %86, %108 : vector<1x128xf32>
    %118 = vector.extract_strided_slice %0 {offsets = [2, 0], sizes = [1, 128], strides = [1, 1]} : vector<8x128xf32> to vector<1x128xf32>
    %119 = arith.subf %28, %118 : vector<1x128xf32>
    %120 = vector.broadcast %45 : vector<64x1xf32> to vector<64x128xf32>
    %121 = vector.broadcast %119 : vector<1x128xf32> to vector<64x128xf32>
    %122 = arith.mulf %120, %121 : vector<64x128xf32>
    %123 = vector.broadcast %46 : vector<64x1xf32> to vector<64x128xf32>
    %124 = arith.addf %122, %123 : vector<64x128xf32>
    %cst_34 = arith.constant 0.000000e+00 : f32
    %125 = vector.broadcast %cst_34 : f32 to vector<64x128xf32>
    %126 = arith.maximumf %124, %125 : vector<64x128xf32>
    %cst_35 = arith.constant dense<0.000000e+00> : vector<8x128xf32>
    %127 = tpu.matmul %48, %126, %cst_35 {dimension_numbers = #tpu.dot_dimension_numbers<[1], [0], [0], [1], [0, 0, 1, 1], [], []>} : vector<8x64xf32>, vector<64x128xf32>, vector<8x128xf32> -> vector<8x128xf32>
    %128 = vector.extract_strided_slice %127 {offsets = [0, 0], sizes = [1, 128], strides = [1, 1]} : vector<8x128xf32> to vector<1x128xf32>
    %129 = vector.broadcast %51 : vector<1x1xf32> to vector<1x128xf32>
    %130 = arith.addf %128, %129 : vector<1x128xf32>
    %131 = vector.extract_strided_slice %127 {offsets = [1, 0], sizes = [1, 128], strides = [1, 1]} : vector<8x128xf32> to vector<1x128xf32>
    %132 = vector.broadcast %52 : vector<1x1xf32> to vector<1x128xf32>
    %133 = arith.addf %131, %132 : vector<1x128xf32>
    %134 = math.tanh %133 : vector<1x128xf32>
    %cst_36 = arith.constant 0.000000e+00 : f32
    %135 = vector.broadcast %cst_36 : f32 to vector<1x128xf32>
    %136 = arith.subf %135, %134 : vector<1x128xf32>
    %137 = math.exp %136 : vector<1x128xf32>
    %cst_37 = arith.constant 5.000000e-01 : f32
    %138 = vector.broadcast %cst_37 : f32 to vector<1x128xf32>
    %139 = arith.mulf %138, %137 : vector<1x128xf32>
    %140 = arith.mulf %130, %130 : vector<1x128xf32>
    %141 = arith.mulf %140, %139 : vector<1x128xf32>
    %cst_38 = arith.constant 5.000000e-01 : f32
    %142 = vector.broadcast %cst_38 : f32 to vector<1x128xf32>
    %143 = arith.mulf %142, %134 : vector<1x128xf32>
    %144 = arith.addf %141, %143 : vector<1x128xf32>
    %145 = arith.mulf %130, %139 : vector<1x128xf32>
    %146 = arith.addf %115, %144 : vector<1x128xf32>
    %147 = arith.addf %116, %145 : vector<1x128xf32>
    %148 = arith.addf %117, %139 : vector<1x128xf32>
    %149 = vector.extract_strided_slice %0 {offsets = [3, 0], sizes = [1, 128], strides = [1, 1]} : vector<8x128xf32> to vector<1x128xf32>
    %150 = arith.subf %28, %149 : vector<1x128xf32>
    %151 = vector.broadcast %45 : vector<64x1xf32> to vector<64x128xf32>
    %152 = vector.broadcast %150 : vector<1x128xf32> to vector<64x128xf32>
    %153 = arith.mulf %151, %152 : vector<64x128xf32>
    %154 = vector.broadcast %46 : vector<64x1xf32> to vector<64x128xf32>
    %155 = arith.addf %153, %154 : vector<64x128xf32>
    %cst_39 = arith.constant 0.000000e+00 : f32
    %156 = vector.broadcast %cst_39 : f32 to vector<64x128xf32>
    %157 = arith.maximumf %155, %156 : vector<64x128xf32>
    %cst_40 = arith.constant dense<0.000000e+00> : vector<8x128xf32>
    %158 = tpu.matmul %48, %157, %cst_40 {dimension_numbers = #tpu.dot_dimension_numbers<[1], [0], [0], [1], [0, 0, 1, 1], [], []>} : vector<8x64xf32>, vector<64x128xf32>, vector<8x128xf32> -> vector<8x128xf32>
    %159 = vector.extract_strided_slice %158 {offsets = [0, 0], sizes = [1, 128], strides = [1, 1]} : vector<8x128xf32> to vector<1x128xf32>
    %160 = vector.broadcast %51 : vector<1x1xf32> to vector<1x128xf32>
    %161 = arith.addf %159, %160 : vector<1x128xf32>
    %162 = vector.extract_strided_slice %158 {offsets = [1, 0], sizes = [1, 128], strides = [1, 1]} : vector<8x128xf32> to vector<1x128xf32>
    %163 = vector.broadcast %52 : vector<1x1xf32> to vector<1x128xf32>
    %164 = arith.addf %162, %163 : vector<1x128xf32>
    %165 = math.tanh %164 : vector<1x128xf32>
    %cst_41 = arith.constant 0.000000e+00 : f32
    %166 = vector.broadcast %cst_41 : f32 to vector<1x128xf32>
    %167 = arith.subf %166, %165 : vector<1x128xf32>
    %168 = math.exp %167 : vector<1x128xf32>
    %cst_42 = arith.constant 5.000000e-01 : f32
    %169 = vector.broadcast %cst_42 : f32 to vector<1x128xf32>
    %170 = arith.mulf %169, %168 : vector<1x128xf32>
    %171 = arith.mulf %161, %161 : vector<1x128xf32>
    %172 = arith.mulf %171, %170 : vector<1x128xf32>
    %cst_43 = arith.constant 5.000000e-01 : f32
    %173 = vector.broadcast %cst_43 : f32 to vector<1x128xf32>
    %174 = arith.mulf %173, %165 : vector<1x128xf32>
    %175 = arith.addf %172, %174 : vector<1x128xf32>
    %176 = arith.mulf %161, %170 : vector<1x128xf32>
    %177 = arith.addf %146, %175 : vector<1x128xf32>
    %178 = arith.addf %147, %176 : vector<1x128xf32>
    %179 = arith.addf %148, %170 : vector<1x128xf32>
    %180 = vector.extract_strided_slice %0 {offsets = [4, 0], sizes = [1, 128], strides = [1, 1]} : vector<8x128xf32> to vector<1x128xf32>
    %181 = arith.subf %28, %180 : vector<1x128xf32>
    %182 = vector.broadcast %45 : vector<64x1xf32> to vector<64x128xf32>
    %183 = vector.broadcast %181 : vector<1x128xf32> to vector<64x128xf32>
    %184 = arith.mulf %182, %183 : vector<64x128xf32>
    %185 = vector.broadcast %46 : vector<64x1xf32> to vector<64x128xf32>
    %186 = arith.addf %184, %185 : vector<64x128xf32>
    %cst_44 = arith.constant 0.000000e+00 : f32
    %187 = vector.broadcast %cst_44 : f32 to vector<64x128xf32>
    %188 = arith.maximumf %186, %187 : vector<64x128xf32>
    %cst_45 = arith.constant dense<0.000000e+00> : vector<8x128xf32>
    %189 = tpu.matmul %48, %188, %cst_45 {dimension_numbers = #tpu.dot_dimension_numbers<[1], [0], [0], [1], [0, 0, 1, 1], [], []>} : vector<8x64xf32>, vector<64x128xf32>, vector<8x128xf32> -> vector<8x128xf32>
    %190 = vector.extract_strided_slice %189 {offsets = [0, 0], sizes = [1, 128], strides = [1, 1]} : vector<8x128xf32> to vector<1x128xf32>
    %191 = vector.broadcast %51 : vector<1x1xf32> to vector<1x128xf32>
    %192 = arith.addf %190, %191 : vector<1x128xf32>
    %193 = vector.extract_strided_slice %189 {offsets = [1, 0], sizes = [1, 128], strides = [1, 1]} : vector<8x128xf32> to vector<1x128xf32>
    %194 = vector.broadcast %52 : vector<1x1xf32> to vector<1x128xf32>
    %195 = arith.addf %193, %194 : vector<1x128xf32>
    %196 = math.tanh %195 : vector<1x128xf32>
    %cst_46 = arith.constant 0.000000e+00 : f32
    %197 = vector.broadcast %cst_46 : f32 to vector<1x128xf32>
    %198 = arith.subf %197, %196 : vector<1x128xf32>
    %199 = math.exp %198 : vector<1x128xf32>
    %cst_47 = arith.constant 5.000000e-01 : f32
    %200 = vector.broadcast %cst_47 : f32 to vector<1x128xf32>
    %201 = arith.mulf %200, %199 : vector<1x128xf32>
    %202 = arith.mulf %192, %192 : vector<1x128xf32>
    %203 = arith.mulf %202, %201 : vector<1x128xf32>
    %cst_48 = arith.constant 5.000000e-01 : f32
    %204 = vector.broadcast %cst_48 : f32 to vector<1x128xf32>
    %205 = arith.mulf %204, %196 : vector<1x128xf32>
    %206 = arith.addf %203, %205 : vector<1x128xf32>
    %207 = arith.mulf %192, %201 : vector<1x128xf32>
    %208 = arith.addf %177, %206 : vector<1x128xf32>
    %209 = arith.addf %178, %207 : vector<1x128xf32>
    %210 = arith.addf %179, %201 : vector<1x128xf32>
    %211 = vector.extract_strided_slice %0 {offsets = [5, 0], sizes = [1, 128], strides = [1, 1]} : vector<8x128xf32> to vector<1x128xf32>
    %212 = arith.subf %28, %211 : vector<1x128xf32>
    %213 = vector.broadcast %45 : vector<64x1xf32> to vector<64x128xf32>
    %214 = vector.broadcast %212 : vector<1x128xf32> to vector<64x128xf32>
    %215 = arith.mulf %213, %214 : vector<64x128xf32>
    %216 = vector.broadcast %46 : vector<64x1xf32> to vector<64x128xf32>
    %217 = arith.addf %215, %216 : vector<64x128xf32>
    %cst_49 = arith.constant 0.000000e+00 : f32
    %218 = vector.broadcast %cst_49 : f32 to vector<64x128xf32>
    %219 = arith.maximumf %217, %218 : vector<64x128xf32>
    %cst_50 = arith.constant dense<0.000000e+00> : vector<8x128xf32>
    %220 = tpu.matmul %48, %219, %cst_50 {dimension_numbers = #tpu.dot_dimension_numbers<[1], [0], [0], [1], [0, 0, 1, 1], [], []>} : vector<8x64xf32>, vector<64x128xf32>, vector<8x128xf32> -> vector<8x128xf32>
    %221 = vector.extract_strided_slice %220 {offsets = [0, 0], sizes = [1, 128], strides = [1, 1]} : vector<8x128xf32> to vector<1x128xf32>
    %222 = vector.broadcast %51 : vector<1x1xf32> to vector<1x128xf32>
    %223 = arith.addf %221, %222 : vector<1x128xf32>
    %224 = vector.extract_strided_slice %220 {offsets = [1, 0], sizes = [1, 128], strides = [1, 1]} : vector<8x128xf32> to vector<1x128xf32>
    %225 = vector.broadcast %52 : vector<1x1xf32> to vector<1x128xf32>
    %226 = arith.addf %224, %225 : vector<1x128xf32>
    %227 = math.tanh %226 : vector<1x128xf32>
    %cst_51 = arith.constant 0.000000e+00 : f32
    %228 = vector.broadcast %cst_51 : f32 to vector<1x128xf32>
    %229 = arith.subf %228, %227 : vector<1x128xf32>
    %230 = math.exp %229 : vector<1x128xf32>
    %cst_52 = arith.constant 5.000000e-01 : f32
    %231 = vector.broadcast %cst_52 : f32 to vector<1x128xf32>
    %232 = arith.mulf %231, %230 : vector<1x128xf32>
    %233 = arith.mulf %223, %223 : vector<1x128xf32>
    %234 = arith.mulf %233, %232 : vector<1x128xf32>
    %cst_53 = arith.constant 5.000000e-01 : f32
    %235 = vector.broadcast %cst_53 : f32 to vector<1x128xf32>
    %236 = arith.mulf %235, %227 : vector<1x128xf32>
    %237 = arith.addf %234, %236 : vector<1x128xf32>
    %238 = arith.mulf %223, %232 : vector<1x128xf32>
    %239 = arith.addf %208, %237 : vector<1x128xf32>
    %240 = arith.addf %209, %238 : vector<1x128xf32>
    %241 = arith.addf %210, %232 : vector<1x128xf32>
    %242 = vector.extract_strided_slice %0 {offsets = [6, 0], sizes = [1, 128], strides = [1, 1]} : vector<8x128xf32> to vector<1x128xf32>
    %243 = arith.subf %28, %242 : vector<1x128xf32>
    %244 = vector.broadcast %45 : vector<64x1xf32> to vector<64x128xf32>
    %245 = vector.broadcast %243 : vector<1x128xf32> to vector<64x128xf32>
    %246 = arith.mulf %244, %245 : vector<64x128xf32>
    %247 = vector.broadcast %46 : vector<64x1xf32> to vector<64x128xf32>
    %248 = arith.addf %246, %247 : vector<64x128xf32>
    %cst_54 = arith.constant 0.000000e+00 : f32
    %249 = vector.broadcast %cst_54 : f32 to vector<64x128xf32>
    %250 = arith.maximumf %248, %249 : vector<64x128xf32>
    %cst_55 = arith.constant dense<0.000000e+00> : vector<8x128xf32>
    %251 = tpu.matmul %48, %250, %cst_55 {dimension_numbers = #tpu.dot_dimension_numbers<[1], [0], [0], [1], [0, 0, 1, 1], [], []>} : vector<8x64xf32>, vector<64x128xf32>, vector<8x128xf32> -> vector<8x128xf32>
    %252 = vector.extract_strided_slice %251 {offsets = [0, 0], sizes = [1, 128], strides = [1, 1]} : vector<8x128xf32> to vector<1x128xf32>
    %253 = vector.broadcast %51 : vector<1x1xf32> to vector<1x128xf32>
    %254 = arith.addf %252, %253 : vector<1x128xf32>
    %255 = vector.extract_strided_slice %251 {offsets = [1, 0], sizes = [1, 128], strides = [1, 1]} : vector<8x128xf32> to vector<1x128xf32>
    %256 = vector.broadcast %52 : vector<1x1xf32> to vector<1x128xf32>
    %257 = arith.addf %255, %256 : vector<1x128xf32>
    %258 = math.tanh %257 : vector<1x128xf32>
    %cst_56 = arith.constant 0.000000e+00 : f32
    %259 = vector.broadcast %cst_56 : f32 to vector<1x128xf32>
    %260 = arith.subf %259, %258 : vector<1x128xf32>
    %261 = math.exp %260 : vector<1x128xf32>
    %cst_57 = arith.constant 5.000000e-01 : f32
    %262 = vector.broadcast %cst_57 : f32 to vector<1x128xf32>
    %263 = arith.mulf %262, %261 : vector<1x128xf32>
    %264 = arith.mulf %254, %254 : vector<1x128xf32>
    %265 = arith.mulf %264, %263 : vector<1x128xf32>
    %cst_58 = arith.constant 5.000000e-01 : f32
    %266 = vector.broadcast %cst_58 : f32 to vector<1x128xf32>
    %267 = arith.mulf %266, %258 : vector<1x128xf32>
    %268 = arith.addf %265, %267 : vector<1x128xf32>
    %269 = arith.mulf %254, %263 : vector<1x128xf32>
    %270 = arith.addf %239, %268 : vector<1x128xf32>
    %271 = arith.addf %240, %269 : vector<1x128xf32>
    %272 = arith.addf %241, %263 : vector<1x128xf32>
    %273 = vector.broadcast %42 : vector<64x1xf32> to vector<64x128xf32>
    %274 = vector.broadcast %28 : vector<1x128xf32> to vector<64x128xf32>
    %275 = arith.mulf %273, %274 : vector<64x128xf32>
    %276 = vector.broadcast %43 : vector<64x1xf32> to vector<64x128xf32>
    %277 = arith.addf %275, %276 : vector<64x128xf32>
    %cst_59 = arith.constant 0.000000e+00 : f32
    %278 = vector.broadcast %cst_59 : f32 to vector<64x128xf32>
    %279 = arith.maximumf %277, %278 : vector<64x128xf32>
    %cst_60 = arith.constant dense<0.000000e+00> : vector<8x128xf32>
    %280 = tpu.matmul %47, %279, %cst_60 {dimension_numbers = #tpu.dot_dimension_numbers<[1], [0], [0], [1], [0, 0, 1, 1], [], []>} : vector<8x64xf32>, vector<64x128xf32>, vector<8x128xf32> -> vector<8x128xf32>
    %281 = vector.extract_strided_slice %280 {offsets = [0, 0], sizes = [1, 128], strides = [1, 1]} : vector<8x128xf32> to vector<1x128xf32>
    %282 = vector.broadcast %49 : vector<1x1xf32> to vector<1x128xf32>
    %283 = arith.addf %281, %282 : vector<1x128xf32>
    %284 = vector.extract_strided_slice %280 {offsets = [1, 0], sizes = [1, 128], strides = [1, 1]} : vector<8x128xf32> to vector<1x128xf32>
    %285 = vector.broadcast %50 : vector<1x1xf32> to vector<1x128xf32>
    %286 = arith.addf %284, %285 : vector<1x128xf32>
    %287 = math.tanh %286 : vector<1x128xf32>
    %cst_61 = arith.constant 0.000000e+00 : f32
    %288 = vector.broadcast %cst_61 : f32 to vector<1x128xf32>
    %289 = arith.subf %288, %287 : vector<1x128xf32>
    %290 = math.exp %289 : vector<1x128xf32>
    %cst_62 = arith.constant 5.000000e-01 : f32
    %291 = vector.broadcast %cst_62 : f32 to vector<1x128xf32>
    %292 = arith.mulf %291, %290 : vector<1x128xf32>
    %293 = arith.mulf %283, %283 : vector<1x128xf32>
    %294 = arith.mulf %293, %292 : vector<1x128xf32>
    %cst_63 = arith.constant 5.000000e-01 : f32
    %295 = vector.broadcast %cst_63 : f32 to vector<1x128xf32>
    %296 = arith.mulf %295, %287 : vector<1x128xf32>
    %297 = arith.addf %294, %296 : vector<1x128xf32>
    %298 = arith.mulf %283, %292 : vector<1x128xf32>
    %cst_64 = arith.constant 7.000000e+00 : f32
    %299 = vector.broadcast %cst_64 : f32 to vector<1x128xf32>
    %300 = arith.mulf %299, %297 : vector<1x128xf32>
    %301 = arith.subf %270, %300 : vector<1x128xf32>
    %cst_65 = arith.constant 7.000000e+00 : f32
    %302 = vector.broadcast %cst_65 : f32 to vector<1x128xf32>
    %303 = arith.mulf %302, %298 : vector<1x128xf32>
    %304 = arith.subf %303, %271 : vector<1x128xf32>
    %cst_66 = arith.constant 7.000000e+00 : f32
    %305 = vector.broadcast %cst_66 : f32 to vector<1x128xf32>
    %306 = arith.mulf %305, %292 : vector<1x128xf32>
    %307 = arith.subf %306, %272 : vector<1x128xf32>
    %308 = vector.extract_strided_slice %0 {offsets = [6, 0], sizes = [1, 128], strides = [1, 1]} : vector<8x128xf32> to vector<1x128xf32>
    %309 = arith.subf %28, %308 : vector<1x128xf32>
    %310 = vector.broadcast %42 : vector<64x1xf32> to vector<64x128xf32>
    %311 = vector.broadcast %309 : vector<1x128xf32> to vector<64x128xf32>
    %312 = arith.mulf %310, %311 : vector<64x128xf32>
    %313 = vector.broadcast %44 : vector<64x1xf32> to vector<64x128xf32>
    %314 = arith.addf %312, %313 : vector<64x128xf32>
    %cst_67 = arith.constant 0.000000e+00 : f32
    %315 = vector.broadcast %cst_67 : f32 to vector<64x128xf32>
    %316 = arith.maximumf %314, %315 : vector<64x128xf32>
    %cst_68 = arith.constant dense<0.000000e+00> : vector<8x128xf32>
    %317 = tpu.matmul %47, %316, %cst_68 {dimension_numbers = #tpu.dot_dimension_numbers<[1], [0], [0], [1], [0, 0, 1, 1], [], []>} : vector<8x64xf32>, vector<64x128xf32>, vector<8x128xf32> -> vector<8x128xf32>
    %318 = vector.extract_strided_slice %317 {offsets = [0, 0], sizes = [1, 128], strides = [1, 1]} : vector<8x128xf32> to vector<1x128xf32>
    %319 = vector.broadcast %49 : vector<1x1xf32> to vector<1x128xf32>
    %320 = arith.addf %318, %319 : vector<1x128xf32>
    %321 = vector.extract_strided_slice %317 {offsets = [1, 0], sizes = [1, 128], strides = [1, 1]} : vector<8x128xf32> to vector<1x128xf32>
    %322 = vector.broadcast %50 : vector<1x1xf32> to vector<1x128xf32>
    %323 = arith.addf %321, %322 : vector<1x128xf32>
    %324 = math.tanh %323 : vector<1x128xf32>
    %cst_69 = arith.constant 0.000000e+00 : f32
    %325 = vector.broadcast %cst_69 : f32 to vector<1x128xf32>
    %326 = arith.subf %325, %324 : vector<1x128xf32>
    %327 = math.exp %326 : vector<1x128xf32>
    %cst_70 = arith.constant 5.000000e-01 : f32
    %328 = vector.broadcast %cst_70 : f32 to vector<1x128xf32>
    %329 = arith.mulf %328, %327 : vector<1x128xf32>
    %330 = arith.mulf %320, %320 : vector<1x128xf32>
    %331 = arith.mulf %330, %329 : vector<1x128xf32>
    %cst_71 = arith.constant 5.000000e-01 : f32
    %332 = vector.broadcast %cst_71 : f32 to vector<1x128xf32>
    %333 = arith.mulf %332, %324 : vector<1x128xf32>
    %334 = arith.addf %331, %333 : vector<1x128xf32>
    %335 = arith.mulf %320, %329 : vector<1x128xf32>
    %cst_72 = arith.constant 7.000000e+00 : f32
    %336 = vector.broadcast %cst_72 : f32 to vector<1x128xf32>
    %337 = arith.mulf %336, %334 : vector<1x128xf32>
    %338 = arith.subf %270, %337 : vector<1x128xf32>
    %cst_73 = arith.constant 7.000000e+00 : f32
    %339 = vector.broadcast %cst_73 : f32 to vector<1x128xf32>
    %340 = arith.mulf %339, %335 : vector<1x128xf32>
    %341 = arith.subf %340, %271 : vector<1x128xf32>
    %cst_74 = arith.constant 7.000000e+00 : f32
    %342 = vector.broadcast %cst_74 : f32 to vector<1x128xf32>
    %343 = arith.mulf %342, %329 : vector<1x128xf32>
    %344 = arith.subf %343, %272 : vector<1x128xf32>
    %345 = tpu.concatenate %34, %39, %40, %41, %9 in 0 : vector<1x128xf32>, vector<1x128xf32>, vector<1x128xf32>, vector<1x128xf32>, vector<1x128xf32> -> vector<5x128xf32>
    %c0_75 = arith.constant 0 : index
    %c0_76 = arith.constant 0 : index
    %346 = vector.load %arg2[%c0_75, %c0_76] : memref<2x128xf32, #tpu.memory_space<vmem>>, vector<1x128xf32>
    %cst_77 = arith.constant 2.000000e+00 : f32
    %347 = vector.broadcast %cst_77 : f32 to vector<1x128xf32>
    %348 = arith.mulf %347, %304 : vector<1x128xf32>
    %349 = arith.mulf %346, %307 : vector<1x128xf32>
    %350 = arith.subf %348, %349 : vector<1x128xf32>
    %351 = arith.mulf %346, %350 : vector<1x128xf32>
    %352 = arith.addf %301, %351 : vector<1x128xf32>
    %353 = vector.broadcast %352 : vector<1x128xf32> to vector<5x128xf32>
    %354 = arith.mulf %353, %345 : vector<5x128xf32>
    %cst_78 = arith.constant dense<0.000000e+00> : vector<5xf32>
    %355 = vector.multi_reduction <add>, %354, %cst_78 [1] : vector<5x128xf32> to vector<5xf32>
    %356 = vector.shape_cast %355 : vector<5xf32> to vector<5x1xf32>
    %c1_79 = arith.constant 1 : index
    %c0_80 = arith.constant 0 : index
    %357 = vector.load %arg2[%c1_79, %c0_80] : memref<2x128xf32, #tpu.memory_space<vmem>>, vector<1x128xf32>
    %cst_81 = arith.constant 2.000000e+00 : f32
    %358 = vector.broadcast %cst_81 : f32 to vector<1x128xf32>
    %359 = arith.mulf %358, %341 : vector<1x128xf32>
    %360 = arith.mulf %357, %344 : vector<1x128xf32>
    %361 = arith.subf %359, %360 : vector<1x128xf32>
    %362 = arith.mulf %357, %361 : vector<1x128xf32>
    %363 = arith.addf %338, %362 : vector<1x128xf32>
    %364 = vector.broadcast %363 : vector<1x128xf32> to vector<5x128xf32>
    %365 = arith.mulf %364, %345 : vector<5x128xf32>
    %cst_82 = arith.constant dense<0.000000e+00> : vector<5xf32>
    %366 = vector.multi_reduction <add>, %365, %cst_82 [1] : vector<5x128xf32> to vector<5xf32>
    %367 = vector.shape_cast %366 : vector<5xf32> to vector<5x1xf32>
    %368 = vector.extract_strided_slice %345 {offsets = [0, 0], sizes = [4, 128], strides = [1, 1]} : vector<5x128xf32> to vector<4x128xf32>
    %cst_83 = arith.constant dense<0.000000e+00> : vector<4xf32>
    %369 = vector.multi_reduction <add>, %368, %cst_83 [1] : vector<4x128xf32> to vector<4xf32>
    %370 = vector.shape_cast %369 : vector<4xf32> to vector<4x1xf32>
    %371 = tpu.concatenate %356, %367, %370 in 0 : vector<5x1xf32>, vector<5x1xf32>, vector<4x1xf32> -> vector<14x1xf32>
    %372 = vector.shape_cast %371 : vector<14x1xf32> to vector<1x14x1xf32>
    %c0_84 = arith.constant 0 : index
    %c0_85 = arith.constant 0 : index
    %c0_86 = arith.constant 0 : index
    %373 = vector.load %arg7[%c0_84, %c0_85, %c0_86] : memref<1x14x1xf32, #tpu.memory_space<vmem>>, vector<1x14x1xf32>
    tpu.vector_store %arg7[%c0_84, %c0_85, %c0_86], %372 {strides = array<i32>} : memref<1x14x1xf32, #tpu.memory_space<vmem>>, vector<1x14x1xf32>,
    return
  }
  func.func @transform_0(%arg0: i32) -> (i32, i32) {
    %c0_i32 = arith.constant 0 : i32
    %c0_i32_0 = arith.constant 0 : i32
    return %c0_i32, %arg0 : i32, i32
  }
  func.func @transform_1(%arg0: i32) -> (i32, i32) {
    %c0_i32 = arith.constant 0 : i32
    %c0_i32_0 = arith.constant 0 : i32
    return %c0_i32, %arg0 : i32, i32
  }
  func.func @transform_2(%arg0: i32) -> (i32, i32) {
    %c0_i32 = arith.constant 0 : i32
    %c0_i32_0 = arith.constant 0 : i32
    %c0_i32_1 = arith.constant 0 : i32
    return %c0_i32, %c0_i32_0 : i32, i32
  }
  func.func @transform_3(%arg0: i32) -> (i32, i32) {
    %c0_i32 = arith.constant 0 : i32
    %c0_i32_0 = arith.constant 0 : i32
    %c0_i32_1 = arith.constant 0 : i32
    return %c0_i32, %c0_i32_0 : i32, i32
  }
  func.func @transform_4(%arg0: i32) -> (i32, i32) {
    %c0_i32 = arith.constant 0 : i32
    %c0_i32_0 = arith.constant 0 : i32
    %c0_i32_1 = arith.constant 0 : i32
    return %c0_i32, %c0_i32_0 : i32, i32
  }
  func.func @transform_5(%arg0: i32) -> (i32, i32) {
    %c0_i32 = arith.constant 0 : i32
    %c0_i32_0 = arith.constant 0 : i32
    %c0_i32_1 = arith.constant 0 : i32
    return %c0_i32, %c0_i32_0 : i32, i32
  }
  func.func @transform_6(%arg0: i32) -> (i32, i32, i32) {
    %c0_i32 = arith.constant 0 : i32
    %c0_i32_0 = arith.constant 0 : i32
    %c0_i32_1 = arith.constant 0 : i32
    return %arg0, %c0_i32, %c0_i32_0 : i32, i32, i32
  }
}

</mosaic_0001>

<bundles_post_ra>
// kernel: tpu_custom_call.1
= control target key start
LH: loop header
LB: loop body
LE: loop exit
PB: predicated region body
PF: predicated region fallthrough
CT: control target
= control target key end

     0   :  { %v1038_v0 = vmov 4   ;;  %vm34_vm0 = vcmask 64512   ;;  %v1039_v6 = vmov 3   ;;  %v1040_v11 = vmov 2   ;;  %s1509_s2 = inlined_call_operand.vmem [shape: f32[64,8], index: 2, kind: input, shape index: {}]   ;;  %s1510_s0 = inlined_call_operand.vmem [shape: f32[8,128], index: 0, kind: input, shape index: {}]   ;;  %s1511_s4 = inlined_call_operand.vmem [shape: f32[8,8], index: 4, kind: input, shape index: {}]   ;;  %s1512_s5 = inlined_call_operand.vmem [shape: f32[8,1], index: 5, kind: input, shape index: {}]   ;;  %s1513_s3 = inlined_call_operand.vmem [shape: f32[16,64], index: 3, kind: input, shape index: {}]   ;;  %s1514_s1 = inlined_call_operand.vmem [shape: f32[2,128], index: 1, kind: input, shape index: {}]   ;;  %s1515_s6 = inlined_call_operand.vmem [shape: f32[1,14,1], index: 6, kind: output, shape index: {}]  }
   0x1   :  { %976 = vset.pattern.permute.xlu0 %v1038_v0  ;;  %974 = vset.pattern.permute.xlu2 %v1038_v0  ;;  %v96_v1 = vld [vmem:[%s1509_s2 + $0x38] sm:$0xff]  ;;  %v95_v2 = vld [vmem:[%s1509_s2 + $0x30] sm:$0xff]  ;;  %v94_v3 = vld [vmem:[%s1509_s2 + $0x28] sm:$0xff]  ;;  %v1041_v13 = vmov 1   ;;  %v1042_v14 = vmov 0   ;;  %vm200_vm1 = vcmask 523264  }
   0x2   :  { %972 = vset.pattern.permute.xlu1 %v1038_v0  ;;  %177 = vperm.xlu2 %974, %v95_v2   ;;  %v1091_v4 = vld [vmem:[%s1510_s0] sm:$0xff]  ;;  %v92_v8 = vld [vmem:[%s1509_s2 + $0x18] sm:$0xff]  ;;  %v91_v9 = vld [vmem:[%s1509_s2 + $0x10] sm:$0xff]  ;;  %vm896_vm5 = vcmask 1040384   ;;  %vm898_vm6 = vcmask 1041408   ;;  %vm900_vm7 = vcmask 1042432  }
   0x3   :  { %v33_v5 = vld [vmem:[%s1511_s4] sm:$0xff]  ;;  %181 = vperm.xlu1 %972, %v96_v1   ;;  %173 = vperm.xlu0 %976, %v94_v3   ;;  %v90_v10 = vld [vmem:[%s1509_s2 + $0x8] sm:$0xff]  ;;  %v100_v23 = vrot.slane %v1091_v4, 7  ;;  %v312_v24 = vrot.slane %v1091_v4, 1  ;;  %v380_v25 = vrot.slane %v1091_v4, 2  ;;  %v448_v28 = vrot.slane %v1091_v4, 3 }
   0x4   :  { %53 = vmatpush.msra.mxu0 %v1091_v4  ;;  %v93_v7 = vld [vmem:[%s1509_s2 + $0x20] sm:$0xff]  ;;  %v516_v29 = vrot.slane %v1091_v4, 4  ;;  %v584_v30 = vrot.slane %v1091_v4, 5  ;;  %vm73_vm2 = vcmp.eq.f32.partialorder %v1091_v4, 0.0  ;;  %vm77_vm4 = vcmp.eq.f32.partialorder %v1091_v4, 1.0 }
   0x5   :  { %953 = vmatmul.msk.f32.vlgmr.msra.gmra.mxu0 %vm34_vm0, %v33_v5  ;;  %v89_v12 = vld [vmem:[%s1509_s2] sm:$0xff]  ;;  %vm902_vm8 = vcmask 1043456   ;;  %vm915_vm9 = vcmask 1044480   ;;  %vm946_vm10 = vcmask 5120   ;;  %vm944_vm11 = vcmask 7168  }
   0x6   :  { %v24_v35 = vld [vmem:[%s1512_s5] sm:$0xff] }
   0xa   :  { %975 = vset.pattern.permute.xlu2 %v1039_v6 }
   0xb   :  { %973 = vset.pattern.permute.xlu1 %v1039_v6  ;;  %977 = vset.pattern.permute.xlu0 %v1039_v6 }
   0xc   :  { %140 = vperm.xlu0 %977, %v96_v1   ;;  %130 = vperm.xlu1 %973, %v94_v3  }
   0xd   :  { %125 = vperm.xlu2 %975, %v93_v7  }
  0x14   :  { %135 = vperm.xlu0 %977, %v95_v2   ;;  %120 = vperm.xlu1 %973, %v92_v8  }
  0x15   :  { %978 = vset.pattern.permute.xlu2 %v1038_v0 }
  0x16   :  { %169 = vperm.xlu2 %978, %v93_v7  }
  0x1c   :  { %115 = vperm.xlu1 %973, %v91_v9   ;;  %110 = vperm.xlu0 %977, %v90_v10  }
  0x1e   :  { %165 = vperm.xlu2 %978, %v92_v8  }
  0x24   :  { %979 = vset.pattern.permute.xlu1 %v1038_v0  ;;  %985 = vset.pattern.permute.xlu0 %v1040_v11 }
  0x25   :  { %161 = vperm.xlu1 %979, %v91_v9   ;;  %822 = vperm.xlu0 %985, %v95_v2  }
  0x26   :  { %980 = vset.pattern.permute.xlu2 %v1039_v6 }
  0x27   :  { %105 = vperm.xlu2 %980, %v89_v12  }
  0x2d   :  { %157 = vperm.xlu1 %979, %v90_v10   ;;  %988 = vset.pattern.permute.xlu0 %v1041_v13 }
  0x2e   :  { %714 = vperm.xlu0 %988, %v94_v3  }
  0x2f   :  { %981 = vset.pattern.permute.xlu2 %v1038_v0 }
  0x30   :  { %153 = vperm.xlu2 %981, %v89_v12  }
  0x35   :  { %982 = vset.pattern.permute.xlu1 %v1042_v14 }
  0x36   :  { %677 = vperm.xlu1 %982, %v95_v2   ;;  %989 = vset.pattern.permute.xlu0 %v1042_v14 }
  0x37   :  { %681 = vperm.xlu0 %989, %v96_v1  }
  0x38   :  { %983 = vset.pattern.permute.xlu2 %v1040_v11 }
  0x39   :  { %826 = vperm.xlu2 %983, %v96_v1  }
  0x3e   :  { %673 = vperm.xlu1 %982, %v94_v3  }
  0x3f   :  { %657 = vperm.xlu0 %989, %v90_v10  }
  0x41   :  { %984 = vset.pattern.permute.xlu2 %v1041_v13 }
  0x42   :  { %722 = vperm.xlu2 %984, %v96_v1  }
  0x46   :  { %669 = vperm.xlu1 %982, %v93_v7  }
  0x47   :  { %994 = vset.pattern.permute.xlu0 %v1040_v11 }
  0x48   :  { %802 = vperm.xlu0 %994, %v90_v10  }
  0x4a   :  { %718 = vperm.xlu2 %984, %v95_v2  }
  0x4e   :  { %986 = vset.pattern.permute.xlu1 %v1040_v11 }
  0x4f   :  { %818 = vperm.xlu1 %986, %v94_v3  }
  0x52   :  { %987 = vset.pattern.permute.xlu2 %v1042_v14 }
  0x53   :  { %665 = vperm.xlu2 %987, %v92_v8  }
  0x57   :  { %814 = vperm.xlu1 %986, %v93_v7  }
  0x5b   :  { %661 = vperm.xlu2 %987, %v91_v9  }
  0x5c   :  { %v1115_v15 = vpop.permute.xlu2 %177 }
  0x5f   :  { %990 = vset.pattern.permute.xlu1 %v1041_v13 }
  0x60   :  { %710 = vperm.xlu1 %990, %v93_v7  }
  0x63   :  { %991 = vset.pattern.permute.xlu2 %v1040_v11 }
  0x64   :  { %810 = vperm.xlu2 %991, %v92_v8  }
  0x67   :  { %v1117_v16 = vpop.permute.xlu2 %125 }
  0x68   :  { %706 = vperm.xlu1 %990, %v92_v8  }
  0x6c   :  { %806 = vperm.xlu2 %991, %v91_v9  }
  0x70   :  { %992 = vset.pattern.permute.xlu1 %v1042_v14  ;;  %v1120_v17 = vpop.permute.xlu2 %169 }
  0x71   :  { %653 = vperm.xlu1 %992, %v89_v12  }
  0x74   :  { %993 = vset.pattern.permute.xlu2 %v1041_v13 }
  0x75   :  { %702 = vperm.xlu2 %993, %v91_v9   ;;  %v1122_v18 = vpop.permute.xlu1 %181  ;;  %v1124_v19 = vpop.permute.xlu0 %173 }
  0x78   :  { %v1126_v20 = vpop.permute.xlu2 %165 }
  0x79   :  { %995 = vset.pattern.permute.xlu1 %v1041_v13 }
  0x7a   :  { %698 = vperm.xlu1 %995, %v90_v10  }
  0x7d   :  { %996 = vset.pattern.permute.xlu2 %v1040_v11 }
  0x7e   :  { %798 = vperm.xlu2 %996, %v89_v12   ;;  %v1128_v21 = vpop.permute.xlu0 %140  ;;  %v1130_v22 = vpop.permute.xlu1 %130 }
  0x81   :  { %v1135_v26 = vpop.permute.xlu2 %105 }
  0x82   :  { %v1137_v27 = vpop.f32.mrf.mxu0  ;;  %694 = vperm.xlu1 %995, %v89_v12  }
  0x83   :  { %v102_v31 = vsub.f32 %v1137_v27, %v100_v23  ;;  %v246_v32 = vsub.f32 %v1137_v27, %v1091_v4  ;;  %v314_v33 = vsub.f32 %v1137_v27, %v312_v24  ;;  %v382_v34 = vsub.f32 %v1137_v27, %v380_v25 }
  0x84   :  { %v450_v40 = vsub.f32 %v1137_v27, %v448_v28  ;;  %v1160_v41 = vsub.f32 %v1137_v27, %v516_v29  ;;  %v1163_v42 = vsub.f32 %v1137_v27, %v584_v30 }
  0x85   :  { %v1150_v36 = vperm.slane %v102_v31, 1  ;;  %v1152_v37 = vperm.slane %v246_v32, 1  ;;  %v1154_v38 = vperm.slane %v314_v33, 1  ;;  %v1156_v39 = vperm.slane %v382_v34, 1 }
  0x86   :  { %997 = vset.pattern.permute.xlu2 %v1042_v14  ;;  %v1166_v43 = vpop.permute.xlu0 %135  ;;  %v1168_v44 = vpop.permute.xlu1 %120  ;;  %v1218_v31 = vperm.slane %v450_v40, 1 }
  0x87   :  { %60 = vperm.xlu2 %997, %v24_v35   ;;  %v151_v45 = vmul.f32 %v1150_v36, %v1128_v21  ;;  %v255_v46 = vmul.f32 %v1152_v37, %v1128_v21  ;;  %v323_v47 = vmul.f32 %v1154_v38, %v1128_v21  ;;  %v391_v48 = vmul.f32 %v1156_v39, %v1128_v21 }
  0x88   :  { %v150_v49 = vmul.f32 %v1150_v36, %v1166_v43  ;;  %v254_v50 = vmul.f32 %v1152_v37, %v1166_v43  ;;  %v322_v51 = vmul.f32 %v1154_v38, %v1166_v43  ;;  %v390_v52 = vmul.f32 %v1156_v39, %v1166_v43 }
  0x89   :  { %v191_v53 = vadd.f32 %v1122_v18, %v151_v45  ;;  %v263_v54 = vadd.f32 %v255_v46, %v1122_v18  ;;  %v331_v55 = vadd.f32 %v323_v47, %v1122_v18  ;;  %v399_v56 = vadd.f32 %v391_v48, %v1122_v18 }
  0x8a   :  { %v1190_v57 = vpop.permute.xlu2 %153  ;;  %v190_v58 = vadd.f32 %v1115_v15, %v150_v49  ;;  %v262_v59 = vadd.f32 %v254_v50, %v1115_v15  ;;  %v330_v60 = vadd.f32 %v322_v51, %v1115_v15  ;;  %v398_v61 = vadd.f32 %v390_v52, %v1115_v15 }
  0x8b   :  { %v199_v62 = vmax.f32 %v191_v53, 0.0  ;;  %v271_v63 = vmax.f32 %v263_v54, 0.0  ;;  %v339_v0 = vmax.f32 %v331_v55, 0.0  ;;  %v407_v1 = vmax.f32 %v399_v56, 0.0 }
  0x8c   :  { %v198_v2 = vmax.f32 %v190_v58, 0.0  ;;  %v270_v3 = vmax.f32 %v262_v59, 0.0  ;;  %v338_v5 = vmax.f32 %v330_v60, 0.0  ;;  %v406_v6 = vmax.f32 %v398_v61, 0.0 }
  0x8d   :  { %212 = vmatpush.msra.mxu1 %v199_v62  ;;  %280 = vmatpush.msra.mxu2 %v271_v63  ;;  %v149_v7 = vmul.f32 %v1150_v36, %v1130_v22  ;;  %v253_v8 = vmul.f32 %v1152_v37, %v1130_v22  ;;  %v321_v9 = vmul.f32 %v1154_v38, %v1130_v22  ;;  %v1232_v52 = vperm.slane %v1160_v41, 1 }
  0x8e   :  { %348 = vmatpush.msra.mxu3 %v339_v0  ;;  %416 = vmatpush.msrb.mxu0 %v407_v1  ;;  %v1202_v10 = vpop.permute.xlu1 %115  ;;  %v389_v11 = vmul.f32 %v1156_v39, %v1130_v22  ;;  %v1206_v12 = vpop.permute.xlu0 %110  ;;  %v148_v13 = vmul.f32 %v1150_v36, %v1117_v16  ;;  %v252_v14 = vmul.f32 %v1152_v37, %v1117_v16 }
  0x8f   :  { %213 = vmatpush.msra.mxu1 %v198_v2  ;;  %281 = vmatpush.msra.mxu2 %v270_v3  ;;  %v189_v23 = vadd.f32 %v1124_v19, %v149_v7  ;;  %v261_v24 = vadd.f32 %v253_v8, %v1124_v19  ;;  %v329_v25 = vadd.f32 %v321_v9, %v1124_v19 }
  0x90   :  { %349 = vmatpush.msra.mxu3 %v338_v5  ;;  %417 = vmatpush.msrb.mxu0 %v406_v6  ;;  %v397_v28 = vadd.f32 %v389_v11, %v1124_v19  ;;  %v188_v29 = vadd.f32 %v1120_v17, %v148_v13  ;;  %v260_v30 = vadd.f32 %v252_v14, %v1120_v17  ;;  %v1258_v13 = vperm.slane %v1163_v42, 1 }
  0x91   :  { %v197_v32 = vmax.f32 %v189_v23, 0.0  ;;  %v269_v33 = vmax.f32 %v261_v24, 0.0  ;;  %v320_v34 = vmul.f32 %v1154_v38, %v1117_v16  ;;  %v337_v35 = vmax.f32 %v329_v25, 0.0 }
  0x92   :  { %v405_v45 = vmax.f32 %v397_v28, 0.0  ;;  %v196_v46 = vmax.f32 %v188_v29, 0.0  ;;  %v388_v47 = vmul.f32 %v1156_v39, %v1117_v16  ;;  %v268_v48 = vmax.f32 %v260_v30, 0.0 }
  0x93   :  { %214 = vmatpush.msra.mxu1 %v197_v32  ;;  %282 = vmatpush.msra.mxu2 %v269_v33  ;;  %v328_v49 = vadd.f32 %v320_v34, %v1120_v17  ;;  %v147_v40 = vmul.f32 %v1150_v36, %v1168_v44  ;;  %v251_v50 = vmul.f32 %v1152_v37, %v1168_v44  ;;  %v1229_v51 = vpop.permute.xlu2 %826 }
  0x94   :  { %350 = vmatpush.msra.mxu3 %v337_v35  ;;  %418 = vmatpush.msrb.mxu0 %v405_v45  ;;  %v396_v53 = vadd.f32 %v388_v47, %v1120_v17  ;;  %v319_v54 = vmul.f32 %v1154_v38, %v1168_v44  ;;  %v387_v55 = vmul.f32 %v1156_v39, %v1168_v44 }
  0x95   :  { %215 = vmatpush.msra.mxu1 %v196_v46  ;;  %283 = vmatpush.msra.mxu2 %v268_v48  ;;  %v336_v56 = vmax.f32 %v328_v49, 0.0  ;;  %v187_v58 = vadd.f32 %v1126_v20, %v147_v40  ;;  %v259_v59 = vadd.f32 %v251_v50, %v1126_v20  ;;  %v146_v41 = vmul.f32 %v1150_v36, %v1202_v10 }
  0x96   :  { %v404_v60 = vmax.f32 %v396_v53, 0.0  ;;  %v327_v61 = vadd.f32 %v319_v54, %v1126_v20  ;;  %v395_v62 = vadd.f32 %v387_v55, %v1126_v20  ;;  %v250_v63 = vmul.f32 %v1152_v37, %v1202_v10 }
  0x97   :  { %351 = vmatpush.msra.mxu3 %v336_v56  ;;  %v195_v0 = vmax.f32 %v187_v58, 0.0  ;;  %v267_v1 = vmax.f32 %v259_v59, 0.0  ;;  %v1247_v2 = vpop.permute.xlu1 %161  ;;  %v1249_v3 = vpop.permute.xlu0 %822  ;;  %v318_v5 = vmul.f32 %v1154_v38, %v1202_v10  ;;  %v386_v6 = vmul.f32 %v1156_v39, %v1202_v10 }
  0x98   :  { %419 = vmatpush.msrb.mxu0 %v404_v60  ;;  %v335_v7 = vmax.f32 %v327_v61, 0.0  ;;  %v403_v8 = vmax.f32 %v395_v62, 0.0  ;;  %v186_v9 = vadd.f32 %v1247_v2, %v146_v41  ;;  %v258_v11 = vadd.f32 %v250_v63, %v1247_v2 }
  0x99   :  { %216 = vmatpush.msra.mxu1 %v195_v0  ;;  %284 = vmatpush.msra.mxu2 %v267_v1  ;;  %v326_v14 = vadd.f32 %v318_v5, %v1247_v2  ;;  %v394_v23 = vadd.f32 %v386_v6, %v1247_v2  ;;  %v145_v24 = vmul.f32 %v1150_v36, %v1206_v12  ;;  %v1286_v40 = vperm.slane %v1137_v27, 1 }
  0x9a   :  { %352 = vmatpush.msra.mxu3 %v335_v7  ;;  %420 = vmatpush.msrb.mxu0 %v403_v8  ;;  %v194_v25 = vmax.f32 %v186_v9, 0.0  ;;  %v266_v28 = vmax.f32 %v258_v11, 0.0  ;;  %v249_v29 = vmul.f32 %v1152_v37, %v1206_v12  ;;  %v317_v42 = vmul.f32 %v1154_v38, %v1206_v12 }
  0x9b   :  { %v334_v30 = vmax.f32 %v326_v14, 0.0  ;;  %v402_v32 = vmax.f32 %v394_v23, 0.0  ;;  %v385_v33 = vmul.f32 %v1156_v39, %v1206_v12  ;;  %v144_v34 = vmul.f32 %v1150_v36, %v1135_v26 }
  0x9c   :  { %217 = vmatpush.msra.mxu1 %v194_v25  ;;  %285 = vmatpush.msra.mxu2 %v266_v28  ;;  %v1272_v35 = vpop.permute.xlu2 %722  ;;  %v248_v45 = vmul.f32 %v1152_v37, %v1135_v26  ;;  %v316_v46 = vmul.f32 %v1154_v38, %v1135_v26  ;;  %v384_v47 = vmul.f32 %v1156_v39, %v1135_v26 }
  0x9d   :  { %353 = vmatpush.msra.mxu3 %v334_v30  ;;  %421 = vmatpush.msrb.mxu0 %v402_v32  ;;  %v184_v48 = vadd.f32 %v1190_v57, %v144_v34  ;;  %v459_v36 = vmul.f32 %v1218_v31, %v1128_v21  ;;  %v527_v49 = vmul.f32 %v1232_v52, %v1128_v21 }
  0x9e   :  { %v256_v38 = vadd.f32 %v248_v45, %v1190_v57  ;;  %v324_v39 = vadd.f32 %v316_v46, %v1190_v57  ;;  %v595_v50 = vmul.f32 %v1258_v13, %v1128_v21  ;;  %v458_v53 = vmul.f32 %v1218_v31, %v1166_v43 }
  0x9f   :  { %v1288_v37 = vpop.permute.xlu1 %157  ;;  %v192_v41 = vmax.f32 %v184_v48, 0.0  ;;  %v392_v60 = vadd.f32 %v384_v47, %v1190_v57  ;;  %v467_v61 = vadd.f32 %v459_v36, %v1122_v18  ;;  %v535_v21 = vadd.f32 %v527_v49, %v1122_v18 }
  0xa0   :  { %v1296_v54 = vpop.permute.xlu0 %714  ;;  %v185_v55 = vadd.f32 %v1288_v37, %v145_v24  ;;  %v257_v56 = vadd.f32 %v249_v29, %v1288_v37  ;;  %v325_v58 = vadd.f32 %v317_v42, %v1288_v37  ;;  %v393_v59 = vadd.f32 %v385_v33, %v1288_v37  ;;  %v1324_v33 = vld [vmem:[%s1513_s3 + $0x8] sm:$0xff] }
  0xa1   :  { %v264_v5 = vmax.f32 %v256_v38, 0.0  ;;  %v603_v6 = vadd.f32 %v595_v50, %v1122_v18  ;;  %v466_v7 = vadd.f32 %v458_v53, %v1115_v15  ;;  %v526_v8 = vmul.f32 %v1232_v52, %v1166_v43 }
  0xa2   :  { %v193_v62 = vmax.f32 %v185_v55, 0.0  ;;  %v265_v63 = vmax.f32 %v257_v56, 0.0  ;;  %v333_v0 = vmax.f32 %v325_v58, 0.0  ;;  %v401_v1 = vmax.f32 %v393_v59, 0.0 }
  0xa3   :  { %v332_v11 = vmax.f32 %v324_v39, 0.0  ;;  %v594_v14 = vmul.f32 %v1258_v13, %v1166_v43  ;;  %v457_v23 = vmul.f32 %v1218_v31, %v1130_v22  ;;  %v525_v24 = vmul.f32 %v1232_v52, %v1130_v22 }
  0xa4   :  { %218 = vmatpush.msra.mxu1 %v193_v62  ;;  %286 = vmatpush.msra.mxu2 %v265_v63  ;;  %v719_v9 = vpop.permute.xlu2 %718  ;;  %v400_v18 = vmax.f32 %v392_v60, 0.0  ;;  %v475_v25 = vmax.f32 %v467_v61, 0.0  ;;  %v534_v28 = vadd.f32 %v526_v8, %v1115_v15  ;;  %v593_v29 = vmul.f32 %v1258_v13, %v1130_v22 }
  0xa5   :  { %354 = vmatpush.msra.mxu3 %v333_v0  ;;  %422 = vmatpush.msrb.mxu0 %v401_v1  ;;  %v543_v42 = vmax.f32 %v535_v21, 0.0  ;;  %v602_v43 = vadd.f32 %v594_v14, %v1115_v15  ;;  %v465_v30 = vadd.f32 %v457_v23, %v1124_v19  ;;  %v533_v32 = vadd.f32 %v525_v24, %v1124_v19 }
  0xa6   :  { %219 = vmatpush.msra.mxu1 %v192_v41  ;;  %287 = vmatpush.msra.mxu2 %v264_v5  ;;  %v611_v34 = vmax.f32 %v603_v6, 0.0  ;;  %v601_v45 = vadd.f32 %v593_v29, %v1124_v19  ;;  %v456_v22 = vmul.f32 %v1218_v31, %v1117_v16  ;;  %v524_v15 = vmul.f32 %v1232_v52, %v1117_v16 }
  0xa7   :  { %355 = vmatpush.msra.mxu3 %v332_v11  ;;  %423 = vmatpush.msrb.mxu0 %v400_v18  ;;  %v474_v47 = vmax.f32 %v466_v7, 0.0  ;;  %v542_v48 = vmax.f32 %v534_v28, 0.0  ;;  %v592_v36 = vmul.f32 %v1258_v13, %v1117_v16  ;;  %v610_v39 = vmax.f32 %v602_v43, 0.0 }
  0xa8   :  { %484 = vmatpush.msrb.mxu1 %v475_v25  ;;  %552 = vmatpush.msrb.mxu2 %v543_v42  ;;  %v678_v46 = vpop.permute.xlu1 %677  ;;  %v464_v19 = vadd.f32 %v456_v22, %v1120_v17  ;;  %v473_v53 = vmax.f32 %v465_v30, 0.0  ;;  %v541_v55 = vmax.f32 %v533_v32, 0.0  ;;  %v532_v56 = vadd.f32 %v524_v15, %v1120_v17 }
  0xa9   :  { %620 = vmatpush.msrb.mxu3 %v611_v34  ;;  %v691_v49 = vmul.f32 %v1286_v40, %v678_v46  ;;  %v682_v38 = vpop.permute.xlu0 %681  ;;  %957 = vmatmul.msk.f32.vlgmr.msra.gmra.mxu1 %vm200_vm1, %v1324_v33  ;;  %v609_v16 = vmax.f32 %v601_v45, 0.0  ;;  %v600_v59 = vadd.f32 %v592_v36, %v1120_v17  ;;  %v455_v21 = vmul.f32 %v1218_v31, %v1168_v44 }
  0xaa   :  { %v692_v50 = vmul.f32 %v1286_v40, %v682_v38  ;;  %485 = vmatpush.msrb.mxu1 %v474_v47  ;;  %553 = vmatpush.msrb.mxu2 %v542_v48  ;;  %v472_v60 = vmax.f32 %v464_v19, 0.0  ;;  %v540_v61 = vmax.f32 %v532_v56, 0.0  ;;  %v523_v0 = vmul.f32 %v1232_v52, %v1168_v44 }
  0xab   :  { %v731_v58 = vadd.f32 %v719_v9, %v691_v49  ;;  %621 = vmatpush.msrb.mxu3 %v610_v39  ;;  %958 = vmatmul.msk.f32.vlgmr.msra.gmra.mxu2 %vm200_vm1, %v1324_v33  ;;  %v608_v62 = vmax.f32 %v600_v59, 0.0  ;;  %v591_v17 = vmul.f32 %v1258_v13, %v1168_v44  ;;  %v796_v5 = vmul.f32 %v682_v38, %v1258_v13 }
  0xac   :  { %v732_v41 = vadd.f32 %v1272_v35, %v692_v50  ;;  %486 = vmatpush.msrb.mxu1 %v473_v53  ;;  %554 = vmatpush.msrb.mxu2 %v541_v55  ;;  %v454_v35 = vmul.f32 %v1218_v31, %v1202_v10  ;;  %v463_v6 = vadd.f32 %v455_v21, %v1126_v20 }
  0xad   :  { %622 = vmatpush.msrb.mxu3 %v609_v16  ;;  %v1345_v63 = vpop.permute.xlu2 %665  ;;  %960 = vmatmul.msk.f32.vlgmr.msrb.gmra.mxu0 %vm200_vm1, %v1324_v33  ;;  %v531_v7 = vadd.f32 %v523_v0, %v1126_v20  ;;  %v599_v8 = vadd.f32 %v591_v17, %v1126_v20  ;;  %v522_v11 = vmul.f32 %v1232_v52, %v1202_v10  ;;  %v739_v23 = vmax.f32 %v731_v58, 0.0 }
  0xae   :  { %v740_v1 = vmax.f32 %v732_v41, 0.0  ;;  %487 = vmatpush.msrb.mxu1 %v472_v60  ;;  %555 = vmatpush.msrb.mxu2 %v540_v61  ;;  %v462_v44 = vadd.f32 %v454_v35, %v1247_v2  ;;  %v590_v14 = vmul.f32 %v1258_v13, %v1202_v10  ;;  %v453_v24 = vmul.f32 %v1218_v31, %v1206_v12 }
  0xaf   :  { %623 = vmatpush.msrb.mxu3 %v608_v62  ;;  %v795_v18 = vmul.f32 %v678_v46, %v1258_v13  ;;  %v471_v20 = vmax.f32 %v463_v6, 0.0  ;;  %v539_v25 = vmax.f32 %v531_v7, 0.0  ;;  %v836_v29 = vadd.f32 %v1229_v51, %v796_v5 }
  0xb0   :  { %v674_v9 = vpop.permute.xlu1 %673  ;;  %752 = vmatpush.msra.mxu0 %v740_v1  ;;  %959 = vmatmul.msk.f32.vlgmr.msra.gmra.mxu3 %vm200_vm1, %v1324_v33  ;;  %v607_v42 = vmax.f32 %v599_v8, 0.0  ;;  %v530_v43 = vadd.f32 %v522_v11, %v1247_v2  ;;  %v598_v10 = vadd.f32 %v590_v14, %v1247_v2  ;;  %v470_v32 = vmax.f32 %v462_v44, 0.0 }
  0xb1   :  { %v690_v28 = vmul.f32 %v1286_v40, %v674_v9  ;;  %488 = vmatpush.msrb.mxu1 %v471_v20  ;;  %556 = vmatpush.msrb.mxu2 %v539_v25  ;;  %v461_v34 = vadd.f32 %v453_v24, %v1288_v37  ;;  %v521_v45 = vmul.f32 %v1232_v52, %v1206_v12  ;;  %v844_v55 = vmax.f32 %v836_v29, 0.0  ;;  %v1400_v16 = vpop.permute.xlu0 %657 }
  0xb2   :  { %753 = vmatpush.msra.mxu0 %v739_v23  ;;  %624 = vmatpush.msrb.mxu3 %v607_v42  ;;  %v538_v22 = vmax.f32 %v530_v43, 0.0  ;;  %v606_v15 = vmax.f32 %v598_v10, 0.0  ;;  %v589_v51 = vmul.f32 %v1258_v13, %v1206_v12  ;;  %v452_v2 = vmul.f32 %v1218_v31, %v1135_v26 }
  0xb3   :  { %v730_v30 = vadd.f32 %v1296_v54, %v690_v28  ;;  %489 = vmatpush.msrb.mxu1 %v470_v32  ;;  %v469_v46 = vmax.f32 %v461_v34, 0.0  ;;  %v529_v47 = vadd.f32 %v521_v45, %v1288_v37  ;;  %v520_v54 = vmul.f32 %v1232_v52, %v1135_v26 }
  0xb4   :  { %v588_v48 = vmul.f32 %v1258_v13, %v1135_v26  ;;  %557 = vmatpush.msrb.mxu2 %v538_v22  ;;  %625 = vmatpush.msrb.mxu3 %v606_v15  ;;  %v597_v49 = vadd.f32 %v589_v51, %v1288_v37  ;;  %v460_v12 = vadd.f32 %v452_v2, %v1190_v57 }
  0xb5   :  { %v1386_v36 = vpop.permute.xlu2 %661  ;;  %v738_v38 = vmax.f32 %v730_v30, 0.0  ;;  %v835_v31 = vadd.f32 %v1249_v3, %v795_v18  ;;  %490 = vmatpush.msrb.mxu1 %v469_v46  ;;  %v537_v39 = vmax.f32 %v529_v47, 0.0  ;;  %v528_v19 = vadd.f32 %v520_v54, %v1190_v57 }
  0xb6   :  { %v596_v52 = vadd.f32 %v588_v48, %v1190_v57  ;;  %v605_v50 = vmax.f32 %v597_v49, 0.0  ;;  %v468_v53 = vmax.f32 %v460_v12, 0.0  ;;  %v794_v3 = vmul.f32 %v674_v9, %v1258_v13 }
  0xb7   :  { %754 = vmatpush.msra.mxu0 %v738_v38  ;;  %558 = vmatpush.msrb.mxu2 %v537_v39  ;;  %v536_v56 = vmax.f32 %v528_v19, 0.0  ;;  %v843_v58 = vmax.f32 %v835_v31, 0.0  ;;  %v792_v61 = vmul.f32 %v1345_v63, %v1258_v13  ;;  %v791_v62 = vmul.f32 %v1386_v36, %v1258_v13 }
  0xb8   :  { %v670_v26 = vpop.permute.xlu1 %669  ;;  %626 = vmatpush.msrb.mxu3 %v605_v50  ;;  %491 = vmatpush.msrb.mxu1 %v468_v53  ;;  %v604_v37 = vmax.f32 %v596_v52, 0.0  ;;  %v688_v28 = vmul.f32 %v1286_v40, %v1345_v63  ;;  %v687_v29 = vmul.f32 %v1286_v40, %v1386_v36  ;;  %v25_v30 = vlaneseq }
  0xb9   :  { %559 = vmatpush.msrb.mxu2 %v536_v56  ;;  %961 = vmatmul.msk.f32.vlgmr.msrb.gmra.mxu1 %vm200_vm1, %v1324_v33  ;;  %v793_v0 = vmul.f32 %v670_v26, %v1258_v13  ;;  %v689_v14 = vmul.f32 %v1286_v40, %v670_v26  ;;  %v1043_v46 = vmov 0.0   ;;  %v686_v4 = vmul.f32 %v1286_v40, %v1400_v16 }
  0xba   :  { %853 = vmatpush.msra.mxu1 %v844_v55  ;;  %627 = vmatpush.msrb.mxu3 %v604_v37  ;;  %v803_v5 = vpop.permute.xlu0 %802  ;;  %v26_v45 = vand.u32 127, %v25_v30  ;;  %v955_v47 = vsel %vm73_vm2, 1.0, %v1043_v46  ;;  %v956_v12 = vsel %vm77_vm4, 1.0, %v1043_v46 }
  0xbb   :  { %962 = vmatmul.msk.f32.vlgmr.msrb.gmra.mxu2 %vm200_vm1, %v1324_v33  ;;  %963 = vmatmul.msk.f32.vlgmr.msrb.gmra.mxu3 %vm200_vm1, %v1324_v33  ;;  %v790_v33 = vmul.f32 %v1400_v16, %v1258_v13 }
  0xbc   :  { %854 = vmatpush.msra.mxu1 %v843_v58  ;;  %vm30_vm3 = vcmp.lt.s32.totalorder %v26_v45, 8 }
  0xbd   :  { %v830_v44 = vadd.f32 %v803_v5, %v790_v33  ;;  %v952_v49 = vsel %vm30_vm3, 1.0, %v1043_v46 }
  0xbe   :  { %v811_v57 = vpop.permute.xlu2 %810  ;;  %v76_v39 = vmul.f32 %v955_v47, %v952_v49 }
  0xbf   :  { %v832_v35 = vadd.f32 %v811_v57, %v792_v61  ;;  %v838_v23 = vmax.f32 %v830_v44, 0.0 }
  0xc0   :  { %v82_v50 = vrot.slane %v76_v39, 7 }
  0xc1   :  { %v819_v59 = vpop.permute.xlu1 %818  ;;  %v840_v8 = vmax.f32 %v832_v35, 0.0 }
  0xc2   :  { %v834_v41 = vadd.f32 %v819_v59, %v794_v3 }
  0xc4   :  { %v842_v60 = vmax.f32 %v834_v41, 0.0 }
  0xc6   :  { %v807_v21 = vpop.permute.xlu2 %806  ;;  %855 = vmatpush.msra.mxu1 %v842_v60 }
  0xc7   :  { %v831_v6 = vadd.f32 %v807_v21, %v791_v62 }
  0xc9   :  { %v815_v17 = vpop.permute.xlu1 %814  ;;  %v839_v9 = vmax.f32 %v831_v6, 0.0 }
  0xca   :  { %v833_v1 = vadd.f32 %v815_v17, %v793_v0 }
  0xcc   :  { %v841_v7 = vmax.f32 %v833_v1, 0.0 }
  0xce   :  { %856 = vmatpush.msra.mxu1 %v841_v7 }
  0xcf   :  { %v703_v11 = vpop.permute.xlu2 %702 }
  0xd0   :  { %857 = vmatpush.msra.mxu1 %v840_v8  ;;  %v727_v43 = vadd.f32 %v703_v11, %v687_v29 }
  0xd2   :  { %v711_v24 = vpop.permute.xlu1 %710  ;;  %858 = vmatpush.msra.mxu1 %v839_v9  ;;  %v735_v34 = vmax.f32 %v727_v43, 0.0 }
  0xd3   :  { %v729_v18 = vadd.f32 %v711_v24, %v689_v14 }
  0xd4   :  { %859 = vmatpush.msra.mxu1 %v838_v23 }
  0xd5   :  { %v737_v20 = vmax.f32 %v729_v18, 0.0 }
  0xd7   :  { %755 = vmatpush.msra.mxu0 %v737_v20 }
  0xd8   :  { %v799_v25 = vpop.permute.xlu2 %798 }
  0xda   :  { %v707_v42 = vpop.permute.xlu1 %706 }
  0xdb   :  { %v728_v10 = vadd.f32 %v707_v42, %v688_v28 }
  0xdd   :  { %v736_v32 = vmax.f32 %v728_v10, 0.0 }
  0xdf   :  { %756 = vmatpush.msra.mxu0 %v736_v32 }
  0xe1   :  { %v1414_v22 = vpop.permute.xlu2 %60  ;;  %757 = vmatpush.msra.mxu0 %v735_v34 }
  0xe2   :  { %v63_v15 = vadd.f32 %v1414_v22, %v1137_v27  ;;  %v97_v27 = vld [vmem:[%s1513_s3] sm:$0xff] }
  0xe3   :  { %v654_v63 = vpop.permute.xlu1 %653 }
  0xe4   :  { %v954_v51 = vclamps-f32 %v63_v15, 9.21024  ;;  %v789_v2 = vmul.f32 %v654_v63, %v1258_v13  ;;  %v80_v13 = vmul.f32 %v956_v12, %v952_v49  ;;  %v685_v41 = vmul.f32 %v1286_v40, %v654_v63 }
  0xe5   :  { %v224_v40 = vrot.slane %v1414_v22, 3 }
  0xe6   :  { %v66_v54 = vsub.f32 0.0, %v954_v51  ;;  %v70_v48 = vmul.f32 1.442695, %v954_v51  ;;  %v829_v36 = vadd.f32 %v799_v25, %v789_v2  ;;  %v888_v26 = vrot.slane %v80_v13, 6 }
  0xe7   :  { %v86_v37 = vrot.slane %v80_v13, 7 }
  0xe8   :  { %v67_v38 = vmul.f32 1.442695, %v66_v54  ;;  %998 = vpow2.f32 %v70_v48  ;;  %v837_v31 = vmax.f32 %v829_v36, 0.0  ;;  %v897_v59 = vsel %vm896_vm5, %v82_v50, %v888_v26 }
  0xea   :  { %1000 = vpow2.f32 %v67_v38  ;;  %860 = vmatpush.msra.mxu1 %v837_v31 }
  0xeb   :  { %965 = vmatmul.msk.f32.vlgmr.msra.gmra.mxu1 %vm200_vm1, %v97_v27 }
  0xec   :  { %v699_v19 = vpop.permute.xlu1 %698 }
  0xed   :  { %v726_v52 = vadd.f32 %v699_v19, %v686_v4  ;;  %v764_v4 = vrot.slane %v1414_v22, 1 }
  0xee   :  { %v999_v53 = vpop.eup %998 }
  0xef   :  { %v72_v55 = vadd.f32 1.0, %v999_v53  ;;  %v734_v56 = vmax.f32 %v726_v52, 0.0 }
  0xf0   :  { %v1001_v58 = vpop.eup %1000 }
  0xf1   :  { %v69_v57 = vadd.f32 1.0, %v1001_v58  ;;  %758 = vmatpush.msra.mxu0 %v734_v56  ;;  %v84_v3 = vmul.f32 %v82_v50, %v72_v55 }
  0xf3   :  { %v88_v16 = vmul.f32 %v86_v37, %v69_v57  ;;  %v891_v60 = vrot.slane %v84_v3, 6 }
  0xf4   :  { %v695_v61 = vpop.permute.xlu1 %694 }
  0xf5   :  { %v725_v21 = vadd.f32 %v695_v61, %v685_v41  ;;  %v894_v62 = vrot.slane %v88_v16, 5  ;;  %v899_v0 = vsel %vm898_vm6, %v897_v59, %v891_v60 }
  0xf7   :  { %v733_v17 = vmax.f32 %v725_v21, 0.0  ;;  %v901_v33 = vsel %vm900_vm7, %v899_v0, %v894_v62 }
  0xf8   :  { %v1429_v35 = vsel %vm902_vm8, %v901_v33, %v952_v49 }
  0xf9   :  { %759 = vmatpush.msra.mxu0 %v733_v17  ;;  %v933_v1 = vsel %vm902_vm8, %v1429_v35, 0.0 }
  0xfa   :  { %934 = vadd.xlane.f32.xlu1 %v933_v1  ;;  %964 = vmatmul.msk.f32.vlgmr.msra.gmra.mxu0 %vm200_vm1, %v97_v27 }
 0x126   :  { %v221_v6 = vpop.f32.mrf.mxu1 }
 0x127   :  { %v226_v7 = vadd.f32 %v224_v40, %v221_v6 }
 0x129   :  { %1002 = vtanh.f32 %v226_v7  ;;  %v232_v55 = vmul.f32 %v226_v7, %v226_v7 }
 0x12a   :  { %v425_v11 = vpop.f32.mrf.mxu0 }
 0x12b   :  { %v1436_v14 = vadd.f32 %v425_v11, %v224_v40 }
 0x12e   :  { %v289_v5 = vpop.f32.mrf.mxu2 }
 0x12f   :  { %v292_v8 = vadd.f32 %v289_v5, %v224_v40  ;;  %v1003_v23 = vpop.eup %1002 }
 0x130   :  { %v228_v20 = vsub.f32 0.0, %v1003_v23  ;;  %v237_v56 = vmul.f32 0.5, %v1003_v23 }
 0x131   :  { %1004 = vtanh.f32 %v292_v8  ;;  %v298_v58 = vmul.f32 %v292_v8, %v292_v8 }
 0x132   :  { %v229_v43 = vmul.f32 1.442695, %v228_v20  ;;  %v239_v0 = vrot.slane %v237_v56, 1 }
 0x133   :  { %v357_v44 = vpop.f32.mrf.mxu3 }
 0x134   :  { %v1434_v9 = vadd.f32 %v357_v44, %v224_v40 }
 0x136   :  { %1006 = vtanh.f32 %v1434_v9  ;;  %v493_v18 = vpop.f32.mrf.mxu1  ;;  %v366_v17 = vmul.f32 %v1434_v9, %v1434_v9 }
 0x137   :  { %v1005_v24 = vpop.eup %1004  ;;  %1008 = vtanh.f32 %v1436_v14  ;;  %v1440_v28 = vadd.f32 %v493_v18, %v224_v40 }
 0x138   :  { %v294_v25 = vsub.f32 0.0, %v1005_v24  ;;  %v303_v57 = vmul.f32 0.5, %v1005_v24  ;;  %v434_v24 = vmul.f32 %v1436_v14, %v1436_v14 }
 0x139   :  { %1010 = vtanh.f32 %v1440_v28 }
 0x13a   :  { %v295_v10 = vmul.f32 1.442695, %v294_v25  ;;  %1012 = vpow2.f32 %v229_v43 }
 0x13c   :  { %v1007_v29 = vpop.eup %1006  ;;  %1014 = vpow2.f32 %v295_v10 }
 0x13d   :  { %v1442_v30 = vpop.eup %1008  ;;  %v362_v32 = vsub.f32 0.0, %v1007_v29  ;;  %v371_v5 = vmul.f32 0.5, %v1007_v29 }
 0x13e   :  { %v561_v42 = vpop.f32.mrf.mxu2  ;;  %v629_v45 = vpop.f32.mrf.mxu3  ;;  %v430_v15 = vsub.f32 0.0, %v1442_v30  ;;  %v439_v18 = vmul.f32 0.5, %v1442_v30 }
 0x13f   :  { %v1445_v34 = vadd.f32 %v561_v42, %v224_v40  ;;  %v363_v63 = vmul.f32 1.442695, %v362_v32  ;;  %v1449_v51 = vadd.f32 %v629_v45, %v224_v40  ;;  %v1451_v2 = vpop.eup %1010  ;;  %v305_v40 = vrot.slane %v303_v57, 1 }
 0x140   :  { %v431_v46 = vmul.f32 1.442695, %v430_v15  ;;  %v1013_v47 = vpop.eup %1012  ;;  %v498_v48 = vsub.f32 0.0, %v1451_v2  ;;  %v373_v43 = vrot.slane %v371_v5, 1 }
 0x141   :  { %1016 = vtanh.f32 %v1445_v34  ;;  %v231_v49 = vmul.f32 0.5, %v1013_v47  ;;  %v502_v47 = vmul.f32 %v1440_v28, %v1440_v28 }
 0x142   :  { %1018 = vpow2.f32 %v363_v63  ;;  %v1015_v54 = vpop.eup %1014  ;;  %v499_v38 = vmul.f32 1.442695, %v498_v48 }
 0x143   :  { %1020 = vtanh.f32 %v1449_v51  ;;  %v297_v12 = vmul.f32 0.5, %v1015_v54  ;;  %v234_v13 = vrot.slane %v231_v49, 1  ;;  %v507_v54 = vmul.f32 0.5, %v1451_v2 }
 0x144   :  { %1022 = vpow2.f32 %v431_v46  ;;  %v441_v46 = vrot.slane %v439_v18, 1 }
 0x145   :  { %v300_v52 = vrot.slane %v297_v12, 1  ;;  %1024 = vpow2.f32 %v499_v38  ;;  %v242_v37 = vmul.f32 %v234_v13, %v226_v7  ;;  %v311_v61 = vadd.f32 %v297_v12, %v231_v49 }
 0x146   :  { %v236_v33 = vmul.f32 %v234_v13, %v232_v55 }
 0x147   :  { %v1455_v36 = vpop.eup %1016  ;;  %v308_v41 = vmul.f32 %v300_v52, %v292_v8  ;;  %v302_v1 = vmul.f32 %v300_v52, %v298_v58  ;;  %v570_v52 = vmul.f32 %v1445_v34, %v1445_v34 }
 0x148   :  { %v566_v31 = vsub.f32 0.0, %v1455_v36  ;;  %v1019_v27 = vpop.eup %1018  ;;  %v241_v20 = vadd.f32 %v239_v0, %v236_v33 }
 0x149   :  { %v1458_v39 = vpop.eup %1020  ;;  %v365_v50 = vmul.f32 0.5, %v1019_v27  ;;  %v310_v6 = vadd.f32 %v308_v41, %v242_v37  ;;  %v307_v25 = vadd.f32 %v305_v40, %v302_v1 }
 0x14a   :  { %v1023_v19 = vpop.eup %1022  ;;  %v567_v53 = vmul.f32 1.442695, %v566_v31  ;;  %v634_v26 = vsub.f32 0.0, %v1458_v39 }
 0x14b   :  { %v433_v3 = vmul.f32 0.5, %v1023_v19  ;;  %v368_v16 = vrot.slane %v365_v50, 1  ;;  %v1025_v62 = vpop.eup %1024  ;;  %v379_v44 = vadd.f32 %v365_v50, %v311_v61  ;;  %v309_v30 = vadd.f32 %v307_v25, %v241_v20 }
 0x14c   :  { %1026 = vpow2.f32 %v567_v53  ;;  %v635_v21 = vmul.f32 1.442695, %v634_v26  ;;  %v501_v11 = vmul.f32 0.5, %v1025_v62  ;;  %v509_v19 = vrot.slane %v507_v54, 1 }
 0x14d   :  { %v376_v7 = vmul.f32 %v368_v16, %v1434_v9  ;;  %v436_v8 = vrot.slane %v433_v3, 1  ;;  %v370_v42 = vmul.f32 %v368_v16, %v366_v17  ;;  %v447_v45 = vadd.f32 %v433_v3, %v379_v44 }
 0x14e   :  { %v504_v9 = vrot.slane %v501_v11, 1  ;;  %v575_v50 = vmul.f32 0.5, %v1455_v36  ;;  %v643_v62 = vmul.f32 0.5, %v1458_v39 }
 0x14f   :  { %v378_v32 = vadd.f32 %v376_v7, %v310_v6  ;;  %v444_v29 = vmul.f32 %v436_v8, %v1436_v14  ;;  %v375_v49 = vadd.f32 %v373_v43, %v370_v42  ;;  %v438_v12 = vmul.f32 %v436_v8, %v434_v24  ;;  %v919_v43 = vld [vmem:[%s1514_s1 + $0x1] sm:$0x1] }
 0x150   :  { %v512_v27 = vmul.f32 %v504_v9, %v1440_v28  ;;  %v515_v13 = vadd.f32 %v501_v11, %v447_v45  ;;  %v506_v56 = vmul.f32 %v504_v9, %v502_v47  ;;  %v577_v3 = vrot.slane %v575_v50, 1 }
 0x151   :  { %v446_v31 = vadd.f32 %v444_v29, %v378_v32  ;;  %v377_v2 = vadd.f32 %v375_v49, %v309_v30  ;;  %v443_v55 = vadd.f32 %v441_v46, %v438_v12  ;;  %v645_v44 = vrot.slane %v643_v62, 1 }
 0x152   :  { %v1027_v23 = vpop.eup %1026  ;;  %v511_v61 = vadd.f32 %v509_v19, %v506_v56 }
 0x153   :  { %v569_v15 = vmul.f32 0.5, %v1027_v23  ;;  %v514_v58 = vadd.f32 %v512_v27, %v446_v31  ;;  %v445_v36 = vadd.f32 %v443_v55, %v377_v2 }
 0x155   :  { %v572_v14 = vrot.slane %v569_v15, 1  ;;  %v583_v57 = vadd.f32 %v569_v15, %v515_v13  ;;  %v513_v6 = vadd.f32 %v511_v61, %v445_v36 }
 0x157   :  { %v580_v28 = vmul.f32 %v572_v14, %v1445_v34 }
 0x159   :  { %v582_v22 = vadd.f32 %v580_v28, %v514_v58  ;;  %v904_v58 = vld [vmem:[%s1514_s1] sm:$0x1] }
 0x168   :  { %v862_v59 = vpop.f32.mrf.mxu1 }
 0x169   :  { %v1464_v60 = vadd.f32 %v862_v59, %v764_v4  ;;  %v638_v59 = vmul.f32 %v1449_v51, %v1449_v51 }
 0x16b   :  { %1028 = vtanh.f32 %v1464_v60  ;;  %v871_v34 = vmul.f32 %v1464_v60, %v1464_v60 }
 0x16c   :  { %1030 = vpow2.f32 %v635_v21  ;;  %v574_v21 = vmul.f32 %v572_v14, %v570_v52 }
 0x16e   :  { %v579_v7 = vadd.f32 %v577_v3, %v574_v21 }
 0x170   :  { %v581_v45 = vadd.f32 %v579_v7, %v513_v6 }
 0x171   :  { %v1029_v10 = vpop.eup %1028 }
 0x172   :  { %v867_v63 = vsub.f32 0.0, %v1029_v10  ;;  %v1031_v48 = vpop.eup %1030  ;;  %v876_v17 = vmul.f32 0.5, %v1029_v10 }
 0x173   :  { %v637_v53 = vmul.f32 0.5, %v1031_v48 }
 0x174   :  { %v868_v38 = vmul.f32 1.442695, %v867_v63  ;;  %v878_v23 = vrot.slane %v876_v17, 1 }
 0x175   :  { %v640_v41 = vrot.slane %v637_v53, 1 }
 0x176   :  { %1032 = vpow2.f32 %v868_v38 }
 0x177   :  { %v761_v26 = vpop.f32.mrf.mxu0  ;;  %v648_v33 = vmul.f32 %v640_v41, %v1449_v51  ;;  %v642_v8 = vmul.f32 %v640_v41, %v638_v59 }
 0x178   :  { %v766_v37 = vadd.f32 %v764_v4, %v761_v26  ;;  %v651_v4 = vadd.f32 %v637_v53, %v583_v57 }
 0x179   :  { %v650_v20 = vadd.f32 %v648_v33, %v582_v22  ;;  %v647_v32 = vadd.f32 %v645_v44, %v642_v8 }
 0x17a   :  { %1034 = vtanh.f32 %v766_v37  ;;  %v772_v38 = vmul.f32 %v766_v37, %v766_v37 }
 0x17b   :  { %v649_v46 = vadd.f32 %v647_v32, %v581_v45 }
 0x17c   :  { %v1033_v16 = vpop.eup %1032 }
 0x17d   :  { %v870_v0 = vmul.f32 0.5, %v1033_v16 }
 0x17f   :  { %v873_v1 = vrot.slane %v870_v0, 1  ;;  %v886_v40 = vmul.f32 7.0, %v870_v0  ;;  %v935_v0 = vpop.xlane.xlu1 %934 }
 0x180   :  { %v1035_v5 = vpop.eup %1034  ;;  %v940_v22 = vrot.slane %v935_v0, 6 }
 0x181   :  { %v875_v11 = vmul.f32 %v873_v1, %v871_v34  ;;  %v881_v39 = vmul.f32 %v873_v1, %v1464_v60  ;;  %v768_v24 = vsub.f32 0.0, %v1035_v5  ;;  %v887_v18 = vsub.f32 %v886_v40, %v651_v4 }
 0x182   :  { %v777_v49 = vmul.f32 0.5, %v1035_v5 }
 0x183   :  { %v880_v25 = vadd.f32 %v878_v23, %v875_v11  ;;  %v884_v42 = vmul.f32 7.0, %v881_v39  ;;  %v769_v51 = vmul.f32 1.442695, %v768_v24  ;;  %v922_v10 = vrot.slane %v887_v18, 1 }
 0x184   :  { %v779_v19 = vrot.slane %v777_v49, 1 }
 0x185   :  { %v885_v29 = vsub.f32 %v884_v42, %v650_v20  ;;  %1036 = vpow2.f32 %v769_v51  ;;  %v924_v9 = vmul.f32 %v922_v10, %v919_v43  ;;  %v882_v63 = vmul.f32 7.0, %v880_v25 }
 0x187   :  { %v920_v15 = vmul.f32 2.0, %v885_v29  ;;  %v883_v54 = vsub.f32 %v649_v46, %v882_v63 }
 0x189   :  { %v925_v60 = vsub.f32 %v920_v15, %v924_v9 }
 0x18b   :  { %v1037_v47 = vpop.eup %1036  ;;  %v926_v48 = vmul.f32 %v925_v60, %v919_v43 }
 0x18c   :  { %v771_v30 = vmul.f32 0.5, %v1037_v47 }
 0x18d   :  { %v927_v12 = vadd.f32 %v926_v48, %v883_v54 }
 0x18e   :  { %v774_v31 = vrot.slane %v771_v30, 1  ;;  %v787_v27 = vmul.f32 7.0, %v771_v30 }
 0x18f   :  { %v928_v13 = vperm.slane %v927_v12, 0 }
 0x190   :  { %v776_v14 = vmul.f32 %v774_v31, %v772_v38  ;;  %v782_v52 = vmul.f32 %v774_v31, %v766_v37  ;;  %v788_v50 = vsub.f32 %v787_v27, %v651_v4 }
 0x191   :  { %v929_v53 = vmul.f32 %v928_v13, %v1429_v35 }
 0x192   :  { %v781_v26 = vadd.f32 %v779_v19, %v776_v14  ;;  %v785_v2 = vmul.f32 7.0, %v782_v52  ;;  %v907_v55 = vrot.slane %v788_v50, 1 }
 0x193   :  { %v930_v56 = vsel %vm915_vm9, %v929_v53, 0.0 }
 0x194   :  { %v786_v28 = vsub.f32 %v785_v2, %v650_v20  ;;  %931 = vadd.xlane.f32.xlu0 %v930_v56  ;;  %v783_v3 = vmul.f32 7.0, %v781_v26  ;;  %v909_v59 = vmul.f32 %v907_v55, %v904_v58 }
 0x196   :  { %v905_v57 = vmul.f32 2.0, %v786_v28  ;;  %v784_v16 = vsub.f32 %v649_v46, %v783_v3 }
 0x198   :  { %v910_v41 = vsub.f32 %v905_v57, %v909_v59 }
 0x19a   :  { %v911_v37 = vmul.f32 %v910_v41, %v904_v58 }
 0x19c   :  { %v912_v36 = vadd.f32 %v911_v37, %v784_v16 }
 0x19e   :  { %v913_v61 = vperm.slane %v912_v36, 0 }
 0x1a0   :  { %v914_v21 = vmul.f32 %v913_v61, %v1429_v35 }
 0x1a2   :  { %v916_v62 = vsel %vm915_vm9, %v914_v21, 0.0 }
 0x1a3   :  { %917 = vadd.xlane.f32.xlu2 %v916_v62 }
 0x207   :  { %v932_v17 = vpop.xlane.xlu0 %931 }
 0x208   :  { %v937_v4 = vrot.slane %v932_v17, 3 }
 0x20a   :  { %v943_v33 = vsel %vm898_vm6, %v937_v4, %v940_v22 }
 0x20b   :  { %947 = vst.msk [vmem:[%s1515_s6 + $0x8] sm:$0x3f] %vm946_vm10, %v943_v33 }
 0x216   :  { %v918_v34 = vpop.xlane.xlu2 %917 }
 0x217   :  { %v942_v1 = vsel %vm915_vm9, %v918_v34, %v937_v4 }
 0x218   :  { %945 = vst.msk [vmem:[%s1515_s6] sm:$0xff] %vm944_vm11, %v942_v1 }

</bundles_post_ra>
